<compile_context>
chip_gen: v5e
topology: v5e:2x2
jax: 0.10.0
libtpu: 0.0.40
codegen_flags: <defaults>
</compile_context>

<pallas_src>
import math
import functools

import jax
import jax.numpy as jnp
from jax import lax
from jax.experimental import pallas as pl
from jax.experimental.pallas import tpu as pltpu


_BF16 = jnp.bfloat16


# ----------------------------- in-kernel math ------------------------------

def _layernorm(x, g, b, eps=1e-5):
    # f32 statistics (matches nn.LayerNorm default eps=1e-5).
    mu = jnp.mean(x, axis=-1, keepdims=True)
    var = jnp.mean((x - mu) ** 2, axis=-1, keepdims=True)
    return (x - mu) * lax.rsqrt(var + eps) * g + b


def _gelu_tanh(x):
    # tanh-based GELU (EUP); |err| vs. exact erf-GELU < ~1e-3.
    c = math.sqrt(2.0 / math.pi)
    return 0.5 * x * (1.0 + jnp.tanh(c * (x + 0.044715 * x * x * x)))


# -------------------- resident-weight BlockSpec helper ----------------------

_BUFFERED_OK = None


def _buffered_single_ok():
    """Eagerly probe (once) whether pipeline_mode=pl.Buffered(1) is supported."""
    global _BUFFERED_OK
    if _BUFFERED_OK is None:
        try:
            def k(a_ref, o_ref):
                o_ref[...] = a_ref[...] + 1.0

            spec = pl.BlockSpec((8, 128), lambda i: (0, 0),
                                pipeline_mode=pl.Buffered(1))
            out = pl.pallas_call(
                k,
                grid=(2,),
                in_specs=[spec],
                out_specs=pl.BlockSpec((8, 128), lambda i: (0, 0)),
                out_shape=jax.ShapeDtypeStruct((8, 128), jnp.float32),
            )(jnp.zeros((8, 128), jnp.float32))
            out = jax.block_until_ready(out)
            _BUFFERED_OK = bool(jnp.all(out == 1.0))
        except Exception:
            _BUFFERED_OK = False
    return _BUFFERED_OK


def _resident(shape, index_map):
    """BlockSpec for a weight whose block index never changes: single-buffer it."""
    if _buffered_single_ok():
        return pl.BlockSpec(shape, index_map, pipeline_mode=pl.Buffered(1))
    return pl.BlockSpec(shape, index_map)


# ------------------------------ Pallas kernels -----------------------------

def ln_qkv_kernel(x_ref, g_ref, b_ref, wqkv_ref, qkv_ref):
    """Pre-norm + fused QKV projection ([D, 3D] weight) for one token tile."""
    xn = _layernorm(x_ref[...], g_ref[...], b_ref[...]).astype(_BF16)
    qkv_ref[...] = jnp.dot(xn, wqkv_ref[...],
                           preferred_element_type=jnp.float32).astype(qkv_ref.dtype)


def attn_proj_kernel(x_ref, qkv_ref, wo_ref, bo_ref, o_ref, *, n_heads, d_k):
    """Causal MHA + W_O projection + bias + residual for one batch element.

    Heads are tiled inside the kernel (static unroll): per-head [S, S] scores
    instead of a monolithic [H, S, S] f32 tensor; the 1/sqrt(d_k) scale is
    already folded into the Q columns of the QKV weight; the context never
    leaves VMEM (W_O partials are accumulated straight onto the residual).
    """
    seq = x_ref.shape[0]
    d_model = n_heads * d_k
    qkv = qkv_ref[...]                                    # [S, 3D] bf16

    row = lax.broadcasted_iota(jnp.int32, (seq, seq), 0)
    col = lax.broadcasted_iota(jnp.int32, (seq, seq), 1)
    causal = row >= col                                   # [S, S]

    acc = x_ref[...] + bo_ref[...]                        # f32 residual + W_O bias
    # TODO(synk): for long sequences, add a (batch, q-tile) grid axis with
    # causal kv-block skipping instead of the full [S, S] score per head.
    for h in range(n_heads):                              # static unroll: head tiling
        q_h = qkv[:, h * d_k:(h + 1) * d_k]
        k_h = qkv[:, d_model + h * d_k: d_model + (h + 1) * d_k]
        v_h = qkv[:, 2 * d_model + h * d_k: 2 * d_model + (h + 1) * d_k]

        s = jnp.einsum('qd,kd->qk', q_h, k_h,
                       preferred_element_type=jnp.float32)        # [S, S] f32
        s = jnp.where(causal, s, -1e9)                    # masked_fill(mask==0, -1e9)
        s = s - jnp.max(s, axis=-1, keepdims=True)
        p = jnp.exp(s)
        p = p * pl.reciprocal(jnp.sum(p, axis=-1, keepdims=True), approx=True)

        ctx_h = jnp.dot(p.astype(_BF16), v_h,
                        preferred_element_type=jnp.float32)       # [S, d_k]
        acc = acc + jnp.dot(ctx_h.astype(_BF16), wo_ref[h],
                            preferred_element_type=jnp.float32)   # += ctx_h @ W_O[h]
    o_ref[...] = acc                                      # lane-dense [S, D] f32 store


def ln_ffn_kernel(x_ref, g_ref, b_ref, w1_ref, b1_ref, w2_ref, b2_ref, o_ref):
    """Pre-norm FFN (GELU) + residual for one token tile."""
    x = x_ref[...]                                        # f32 [TM, D]
    xn = _layernorm(x, g_ref[...], b_ref[...]).astype(_BF16)
    h = jnp.dot(xn, w1_ref[...], preferred_element_type=jnp.float32) + b1_ref[...]
    h = _gelu_tanh(h).astype(_BF16)
    ff = jnp.dot(h, w2_ref[...], preferred_element_type=jnp.float32) + b2_ref[...]
    o_ref[...] = x + ff                                   # residual (f32)


def final_kernel(x_ref, g_ref, b_ref, wout_ref, bout_ref, o_ref, xn_ref):
    """Final LayerNorm (cached per token tile) + one (token, vocab) logits slab."""
    @pl.when(pl.program_id(1) == 0)
    def _():
        xn_ref[...] = _layernorm(x_ref[...], g_ref[...], b_ref[...]).astype(_BF16)
    o_ref[...] = jnp.dot(xn_ref[...], wout_ref[...],
                         preferred_element_type=jnp.float32) + bout_ref[...]


# ------------------------------ wrappers ------------------------------------

def _pick_tile(n, target, quantum):
    """Largest power-of-two-ish tile <= target that divides n (prefers >1 blocks)."""
    c = target
    while c >= quantum:
        if n % c == 0 and c < n:
            return c
        c //= 2
    return n


def _chip_config():
    """Generation-aware tile targets / VMEM budget."""
    try:
        kind = jax.devices()[0].device_kind.lower()
    except Exception:
        kind = ''
    if '7' in kind:
        # v7x: 64 MiB VMEM per TensorCore -> conservative budget & tiles.
        return dict(vmem=48 * 1024 * 1024, tm=256, tm_final=512, tv=512)
    if 'v5' in kind or 'v6' in kind:
        # v5e/v6e: 128 MiB VMEM -> bigger tiles, larger lm-head slabs.
        return dict(vmem=100 * 1024 * 1024, tm=512, tm_final=1024, tv=1024)
    return dict(vmem=48 * 1024 * 1024, tm=256, tm_final=512, tv=512)


def _cparams(dims, cfg):
    return pltpu.CompilerParams(dimension_semantics=dims,
                                vmem_limit_bytes=cfg['vmem'])


def run_ln_qkv(x2d, g, b, wqkv, *, tm, cfg):
    n, d = x2d.shape
    d3 = wqkv.shape[1]
    return pl.pallas_call(
        ln_qkv_kernel,
        grid=(n // tm,),
        in_specs=[pl.BlockSpec((tm, d), lambda i: (i, 0)),
                  _resident((1, d), lambda i: (0, 0)),
                  _resident((1, d), lambda i: (0, 0)),
                  _resident((d, d3), lambda i: (0, 0))],
        out_specs=pl.BlockSpec((tm, d3), lambda i: (i, 0)),
        out_shape=jax.ShapeDtypeStruct((n, d3), _BF16),     # bf16 inter-kernel act.
        compiler_params=_cparams(("parallel",), cfg),
    )(x2d, g, b, wqkv)


def run_attn_proj(x2d, qkv, wo_r, bo, *, seq, cfg):
    n, d = x2d.shape
    d3 = qkv.shape[1]
    nb = n // seq
    n_heads, d_k, _ = wo_r.shape
    kernel = functools.partial(attn_proj_kernel, n_heads=n_heads, d_k=d_k)
    return pl.pallas_call(
        kernel,
        grid=(nb,),
        in_specs=[pl.BlockSpec((seq, d), lambda bi: (bi, 0)),
                  pl.BlockSpec((seq, d3), lambda bi: (bi, 0)),
                  _resident((n_heads, d_k, d), lambda bi: (0, 0, 0)),
                  _resident((1, d), lambda bi: (0, 0))],
        out_specs=pl.BlockSpec((seq, d), lambda bi: (bi, 0)),
        out_shape=jax.ShapeDtypeStruct((n, d), jnp.float32),
        input_output_aliases={0: 0},              # residual updated in place
        compiler_params=_cparams(("parallel",), cfg),
    )(x2d, qkv, wo_r, bo)


def run_ln_ffn(x2d, layer, *, tm, cfg):
    n, d = x2d.shape
    d_ff = layer['w1'].shape[1]
    tok = pl.BlockSpec((tm, d), lambda i: (i, 0))
    return pl.pallas_call(
        ln_ffn_kernel,
        grid=(n // tm,),
        in_specs=[tok,
                  _resident((1, d), lambda i: (0, 0)),
                  _resident((1, d), lambda i: (0, 0)),
                  _resident((d, d_ff), lambda i: (0, 0)),
                  _resident((1, d_ff), lambda i: (0, 0)),
                  _resident((d_ff, d), lambda i: (0, 0)),
                  _resident((1, d), lambda i: (0, 0))],
        out_specs=tok,
        out_shape=jax.ShapeDtypeStruct((n, d), jnp.float32),
        input_output_aliases={0: 0},              # residual updated in place
        compiler_params=_cparams(("parallel",), cfg),
    )(x2d, layer['ln2_g'], layer['ln2_b'], layer['w1'], layer['b1'],
      layer['w2'], layer['b2'])


def run_final(x2d, g, b, w_out, b_out, *, tm, tv, cfg):
    n, d = x2d.shape
    v = w_out.shape[1]
    return pl.pallas_call(
        final_kernel,
        grid=(n // tm, v // tv),                  # vocab axis innermost -> xn reuse
        in_specs=[pl.BlockSpec((tm, d), lambda i, j: (i, 0)),
                  _resident((1, d), lambda i, j: (0, 0)),
                  _resident((1, d), lambda i, j: (0, 0)),
                  pl.BlockSpec((d, tv), lambda i, j: (0, j)),
                  pl.BlockSpec((1, tv), lambda i, j: (0, j))],
        out_specs=pl.BlockSpec((tm, tv), lambda i, j: (i, j)),
        out_shape=jax.ShapeDtypeStruct((n, v), jnp.float32),
        scratch_shapes=[pltpu.VMEM((tm, d), _BF16)],   # cached LayerNorm'd tile
        compiler_params=_cparams(("parallel", "arbitrary"), cfg),
    )(x2d, g, b, w_out, b_out)


# ------------------------------ forward --------------------------------------

def _gpt1_forward(params, token_ids):
    B, S = token_ids.shape
    D = params['tok_emb'].shape[1]
    V = params['w_out'].shape[1]
    n = B * S
    cfg = _chip_config()
    tm = _pick_tile(n, cfg['tm'], 8)         # token tile (multiple of 8 sublanes)
    tm_f = _pick_tile(n, cfg['tm_final'], 8)  # larger tile for the lm-head kernel
    tv = _pick_tile(V, cfg['tv'], 128)        # lane-dense vocab tile

    # Embedding gather + positional add kept as plain-JAX glue (dropout = id).
    # TODO(synk): fuse the embedding gather into the first LN+QKV kernel via a
    # scalar-prefetch row-gather BlockSpec.
    x = jnp.take(params['tok_emb'], token_ids, axis=0) + params['pos_emb'][:S][None]
    x2d = x.reshape(n, D).astype(jnp.float32)

    for layer in params['layers']:
        qkv = run_ln_qkv(x2d, layer['ln1_g'], layer['ln1_b'], layer['wqkv'],
                         tm=tm, cfg=cfg)
        x2d = run_attn_proj(x2d, qkv, layer['wo'], layer['bo'], seq=S, cfg=cfg)
        x2d = run_ln_ffn(x2d, layer, tm=tm, cfg=cfg)

    logits2d = run_final(x2d, params['lnf_g'], params['lnf_b'],
                         params['w_out'], params['b_out'],
                         tm=tm_f, tv=tv, cfg=cfg)
    return logits2d.reshape(B, S, V)


_gpt1_forward_jit = jax.jit(_gpt1_forward)


def gpt1_forward(params, token_ids):
    _buffered_single_ok()          # eager feature probe (cached), outside the trace
    return _gpt1_forward_jit(params, token_ids)


# ------------------------------ parameters ----------------------------------

def init_params(key, vocab, d_model, n_heads, n_layers, d_ff, max_seq):
    keys = jax.random.split(key, 3 + n_layers)

    def xavier(k, fan_in, fan_out):
        limit = math.sqrt(6.0 / (fan_in + fan_out))
        return jax.random.uniform(k, (fan_in, fan_out), jnp.float32, -limit, limit)

    params = {
        'tok_emb': 0.02 * jax.random.normal(keys[0], (vocab, d_model), jnp.float32),
        'pos_emb': 0.02 * jax.random.normal(keys[1], (max_seq, d_model), jnp.float32),
        'w_out': 0.02 * jax.random.normal(keys[2], (d_model, vocab), jnp.float32),
        'b_out': jnp.zeros((1, vocab), jnp.float32),
        'lnf_g': jnp.ones((1, d_model), jnp.float32),
        'lnf_b': jnp.zeros((1, d_model), jnp.float32),
        'layers': [],
    }
    for i in range(n_layers):
        lk = jax.random.split(keys[3 + i], 6)
        params['layers'].append({
            'ln1_g': jnp.ones((1, d_model), jnp.float32),
            'ln1_b': jnp.zeros((1, d_model), jnp.float32),
            'wq': xavier(lk[0], d_model, d_model),
            'wk': xavier(lk[1], d_model, d_model),
            'wv': xavier(lk[2], d_model, d_model),
            'wo': xavier(lk[3], d_model, d_model),
            'bo': jnp.zeros((1, d_model), jnp.float32),
            'ln2_g': jnp.ones((1, d_model), jnp.float32),
            'ln2_b': jnp.zeros((1, d_model), jnp.float32),
            'w1': xavier(lk[4], d_model, d_ff),
            'b1': jnp.zeros((1, d_ff), jnp.float32),
            'w2': xavier(lk[5], d_ff, d_model),
            'b2': jnp.zeros((1, d_model), jnp.float32),
        })
    return params


def prepare_params(params, n_heads):
    """One-time kernel-side weight prep: bf16 casts, fused QKV weight with the
    1/sqrt(d_k) scale folded into W_Q, and per-head-reshaped W_O."""
    d_model = params['tok_emb'].shape[1]
    d_k = d_model // n_heads
    inv_scale = 1.0 / math.sqrt(d_k)
    layers = []
    for layer in params['layers']:
        wqkv = jnp.concatenate(
            [layer['wq'] * inv_scale, layer['wk'], layer['wv']], axis=1).astype(_BF16)
        wo_r = layer['wo'].reshape(n_heads, d_k, d_model).astype(_BF16)
        # TODO(synk): on v7x, W1/W2 could additionally be stored in fp8.
        layers.append({
            'ln1_g': layer['ln1_g'], 'ln1_b': layer['ln1_b'],
            'wqkv': wqkv, 'wo': wo_r, 'bo': layer['bo'],
            'ln2_g': layer['ln2_g'], 'ln2_b': layer['ln2_b'],
            'w1': layer['w1'].astype(_BF16), 'b1': layer['b1'],
            'w2': layer['w2'].astype(_BF16), 'b2': layer['b2'],
        })
    return {
        'tok_emb': params['tok_emb'], 'pos_emb': params['pos_emb'],
        'lnf_g': params['lnf_g'], 'lnf_b': params['lnf_b'],
        'w_out': params['w_out'].astype(_BF16), 'b_out': params['b_out'],
        'layers': layers,
    }


# ------------------------------ pure-JAX reference ---------------------------

def reference_forward(params, ids, n_heads):
    B, S = ids.shape
    D = params['tok_emb'].shape[1]
    d_k = D // n_heads

    def ln(x, g, b):
        mu = x.mean(-1, keepdims=True)
        var = ((x - mu) ** 2).mean(-1, keepdims=True)
        return (x - mu) / jnp.sqrt(var + 1e-5) * g + b

    x = jnp.take(params['tok_emb'], ids, axis=0) + params['pos_emb'][:S][None]
    causal = jnp.tril(jnp.ones((S, S)))
    for layer in params['layers']:
        xn = ln(x, layer['ln1_g'], layer['ln1_b'])
        q = (xn @ layer['wq']).reshape(B, S, n_heads, d_k).transpose(0, 2, 1, 3)
        k = (xn @ layer['wk']).reshape(B, S, n_heads, d_k).transpose(0, 2, 1, 3)
        v = (xn @ layer['wv']).reshape(B, S, n_heads, d_k).transpose(0, 2, 1, 3)
        s = jnp.einsum('bhqd,bhkd->bhqk', q, k) / math.sqrt(d_k)
        s = jnp.where(causal[None, None] == 0, -1e9, s)
        p = jax.nn.softmax(s, axis=-1)
        ctx = jnp.einsum('bhqk,bhkd->bhqd', p, v).transpose(0, 2, 1, 3).reshape(B, S, D)
        x = x + ctx @ layer['wo'] + layer['bo']
        xn2 = ln(x, layer['ln2_g'], layer['ln2_b'])
        h = jax.nn.gelu(xn2 @ layer['w1'] + layer['b1'], approximate=False)
        x = x + h @ layer['w2'] + layer['b2']
    xn = ln(x, params['lnf_g'], params['lnf_b'])
    return xn @ params['w_out'] + params['b_out']


# ---------------------------------- main -------------------------------------

if __name__ == "__main__":
    vocab, d_model, n_heads, n_layers, d_ff, max_seq = 256, 32, 4, 2, 64, 16
    B, S = 2, 8

    key = jax.random.PRNGKey(0)
    pkey, ikey = jax.random.split(key)
    params = init_params(pkey, vocab, d_model, n_heads, n_layers, d_ff, max_seq)
    token_ids = jax.random.randint(ikey, (B, S), 0, vocab, dtype=jnp.int32)

    prepped = prepare_params(params, n_heads)       # one-time bf16 / fused-weight prep
    logits = gpt1_forward(prepped, token_ids)
    logits = jax.block_until_ready(logits)

    assert logits.shape == (B, S, vocab)
    ref = reference_forward(params, token_ids, n_heads)
    max_err = float(jnp.max(jnp.abs(logits - ref)))
    # bf16 matmul operands (f32 accumulation), approx reciprocal and tanh-GELU
    # bound the deviation from the f32/erf reference well below this tolerance.
    assert math.isfinite(max_err) and max_err < 5e-2, f"max abs err = {max_err}"

    print("KERNEL_OK")
</pallas_src>

<mosaic_0001>
module attributes {stable_mosaic.version = 11 : i64} {
  func.func @k(%arg0: i32, %arg1: memref<8x128xf32, #tpu.memory_space<vmem>>, %arg2: memref<8x128xf32, #tpu.memory_space<vmem>>) attributes {dimension_semantics = [#tpu.dimension_semantics<arbitrary>], iteration_bounds = array<i64: 2>, scalar_prefetch = 0 : i64, scratch_operands = 0 : i64, tpu.core_type = #tpu.core_type<tc>, window_params = [{pipeline_mode = #tpu.pipeline_mode<synchronous>, transform_indices = @transform_0, window_bounds = array<i64: 8, 128>}, {pipeline_mode = #tpu.pipeline_mode<synchronous>, transform_indices = @transform_1, window_bounds = array<i64: 8, 128>}]} {
    %c0 = arith.constant 0 : index
    %c0_0 = arith.constant 0 : index
    %0 = vector.load %arg1[%c0, %c0_0] : memref<8x128xf32, #tpu.memory_space<vmem>>, vector<8x128xf32>
    %cst = arith.constant 1.000000e+00 : f32
    %1 = vector.broadcast %cst : f32 to vector<8x128xf32>
    %2 = arith.addf %0, %1 : vector<8x128xf32>
    %c0_1 = arith.constant 0 : index
    %c0_2 = arith.constant 0 : index
    %3 = vector.load %arg2[%c0_1, %c0_2] : memref<8x128xf32, #tpu.memory_space<vmem>>, vector<8x128xf32>
    tpu.vector_store %arg2[%c0_1, %c0_2], %2 {strides = array<i32>} : memref<8x128xf32, #tpu.memory_space<vmem>>, vector<8x128xf32>,
    return
  }
  func.func @transform_0(%arg0: i32) -> (i32, i32) {
    %c0_i32 = arith.constant 0 : i32
    %c0_i32_0 = arith.constant 0 : i32
    %c0_i32_1 = arith.constant 0 : i32
    return %c0_i32, %c0_i32_0 : i32, i32
  }
  func.func @transform_1(%arg0: i32) -> (i32, i32) {
    %c0_i32 = arith.constant 0 : i32
    %c0_i32_0 = arith.constant 0 : i32
    %c0_i32_1 = arith.constant 0 : i32
    return %c0_i32, %c0_i32_0 : i32, i32
  }
}

module attributes {stable_mosaic.version = 11 : i64} {
  func.func @ln_qkv_kernel(%arg0: i32, %arg1: memref<8x32xf32, #tpu.memory_space<vmem>>, %arg2: memref<1x32xf32, #tpu.memory_space<vmem>>, %arg3: memref<1x32xf32, #tpu.memory_space<vmem>>, %arg4: memref<32x96xbf16, #tpu.memory_space<vmem>>, %arg5: memref<8x96xbf16, #tpu.memory_space<vmem>>) attributes {dimension_semantics = [#tpu.dimension_semantics<parallel>], iteration_bounds = array<i64: 2>, scalar_prefetch = 0 : i64, scratch_operands = 0 : i64, tpu.core_type = #tpu.core_type<tc>, window_params = [{transform_indices = @transform_0, window_bounds = array<i64: 8, 32>}, {pipeline_mode = #tpu.pipeline_mode<synchronous>, transform_indices = @transform_1, window_bounds = array<i64: 1, 32>}, {pipeline_mode = #tpu.pipeline_mode<synchronous>, transform_indices = @transform_2, window_bounds = array<i64: 1, 32>}, {pipeline_mode = #tpu.pipeline_mode<synchronous>, transform_indices = @transform_3, window_bounds = array<i64: 32, 96>}, {transform_indices = @transform_4, window_bounds = array<i64: 8, 96>}]} {
    %c0 = arith.constant 0 : index
    %c0_0 = arith.constant 0 : index
    %0 = vector.load %arg1[%c0, %c0_0] : memref<8x32xf32, #tpu.memory_space<vmem>>, vector<8x32xf32>
    %c0_1 = arith.constant 0 : index
    %c0_2 = arith.constant 0 : index
    %1 = vector.load %arg2[%c0_1, %c0_2] : memref<1x32xf32, #tpu.memory_space<vmem>>, vector<1x32xf32>
    %c0_3 = arith.constant 0 : index
    %c0_4 = arith.constant 0 : index
    %2 = vector.load %arg3[%c0_3, %c0_4] : memref<1x32xf32, #tpu.memory_space<vmem>>, vector<1x32xf32>
    %cst = arith.constant dense<0.000000e+00> : vector<8xf32>
    %3 = vector.multi_reduction <add>, %0, %cst [1] : vector<8x32xf32> to vector<8xf32>
    %4 = vector.shape_cast %3 : vector<8xf32> to vector<8x1xf32>
    %cst_5 = arith.constant 3.200000e+01 : f32
    %5 = vector.broadcast %cst_5 : f32 to vector<8x1xf32>
    %6 = arith.divf %4, %5 : vector<8x1xf32>
    %7 = vector.broadcast %6 : vector<8x1xf32> to vector<8x32xf32>
    %8 = arith.subf %0, %7 : vector<8x32xf32>
    %9 = arith.mulf %8, %8 : vector<8x32xf32>
    %cst_6 = arith.constant dense<0.000000e+00> : vector<8xf32>
    %10 = vector.multi_reduction <add>, %9, %cst_6 [1] : vector<8x32xf32> to vector<8xf32>
    %11 = vector.shape_cast %10 : vector<8xf32> to vector<8x1xf32>
    %cst_7 = arith.constant 3.200000e+01 : f32
    %12 = vector.broadcast %cst_7 : f32 to vector<8x1xf32>
    %13 = arith.divf %11, %12 : vector<8x1xf32>
    %14 = vector.broadcast %6 : vector<8x1xf32> to vector<8x32xf32>
    %15 = arith.subf %0, %14 : vector<8x32xf32>
    %cst_8 = arith.constant 9.99999974E-6 : f32
    %16 = vector.broadcast %cst_8 : f32 to vector<8x1xf32>
    %17 = arith.addf %13, %16 : vector<8x1xf32>
    %18 = math.rsqrt %17 : vector<8x1xf32>
    %19 = vector.broadcast %18 : vector<8x1xf32> to vector<8x32xf32>
    %20 = arith.mulf %15, %19 : vector<8x32xf32>
    %21 = vector.broadcast %1 : vector<1x32xf32> to vector<8x32xf32>
    %22 = arith.mulf %20, %21 : vector<8x32xf32>
    %23 = vector.broadcast %2 : vector<1x32xf32> to vector<8x32xf32>
    %24 = arith.addf %22, %23 : vector<8x32xf32>
    %25 = arith.truncf %24 : vector<8x32xf32> to vector<8x32xbf16>
    %c0_9 = arith.constant 0 : index
    %c0_10 = arith.constant 0 : index
    %26 = vector.load %arg4[%c0_9, %c0_10] : memref<32x96xbf16, #tpu.memory_space<vmem>>, vector<32x96xbf16>
    %cst_11 = arith.constant dense<0.000000e+00> : vector<8x96xf32>
    %27 = tpu.matmul %25, %26, %cst_11 {dimension_numbers = #tpu.dot_dimension_numbers<[1], [0], [0], [1], [0, 0, 1, 1], [], []>} : vector<8x32xbf16>, vector<32x96xbf16>, vector<8x96xf32> -> vector<8x96xf32>
    %28 = arith.truncf %27 : vector<8x96xf32> to vector<8x96xbf16>
    %c0_12 = arith.constant 0 : index
    %c0_13 = arith.constant 0 : index
    %29 = vector.load %arg5[%c0_12, %c0_13] : memref<8x96xbf16, #tpu.memory_space<vmem>>, vector<8x96xbf16>
    tpu.vector_store %arg5[%c0_12, %c0_13], %28 {strides = array<i32>} : memref<8x96xbf16, #tpu.memory_space<vmem>>, vector<8x96xbf16>,
    return
  }
  func.func @transform_0(%arg0: i32) -> (i32, i32) {
    %c0_i32 = arith.constant 0 : i32
    %c0_i32_0 = arith.constant 0 : i32
    return %arg0, %c0_i32 : i32, i32
  }
  func.func @transform_1(%arg0: i32) -> (i32, i32) {
    %c0_i32 = arith.constant 0 : i32
    %c0_i32_0 = arith.constant 0 : i32
    %c0_i32_1 = arith.constant 0 : i32
    return %c0_i32, %c0_i32_0 : i32, i32
  }
  func.func @transform_2(%arg0: i32) -> (i32, i32) {
    %c0_i32 = arith.constant 0 : i32
    %c0_i32_0 = arith.constant 0 : i32
    %c0_i32_1 = arith.constant 0 : i32
    return %c0_i32, %c0_i32_0 : i32, i32
  }
  func.func @transform_3(%arg0: i32) -> (i32, i32) {
    %c0_i32 = arith.constant 0 : i32
    %c0_i32_0 = arith.constant 0 : i32
    %c0_i32_1 = arith.constant 0 : i32
    return %c0_i32, %c0_i32_0 : i32, i32
  }
  func.func @transform_4(%arg0: i32) -> (i32, i32) {
    %c0_i32 = arith.constant 0 : i32
    %c0_i32_0 = arith.constant 0 : i32
    return %arg0, %c0_i32 : i32, i32
  }
}

module attributes {stable_mosaic.version = 11 : i64} {
  func.func @attn_proj_kernel(%arg0: i32, %arg1: memref<8x32xf32, #tpu.memory_space<vmem>>, %arg2: memref<8x96xbf16, #tpu.memory_space<vmem>>, %arg3: memref<4x8x32xbf16, #tpu.memory_space<vmem>>, %arg4: memref<1x32xf32, #tpu.memory_space<vmem>>, %arg5: memref<8x32xf32, #tpu.memory_space<vmem>>) attributes {dimension_semantics = [#tpu.dimension_semantics<parallel>], iteration_bounds = array<i64: 2>, scalar_prefetch = 0 : i64, scratch_operands = 0 : i64, tpu.core_type = #tpu.core_type<tc>, window_params = [{transform_indices = @transform_0, window_bounds = array<i64: 8, 32>}, {transform_indices = @transform_1, window_bounds = array<i64: 8, 96>}, {pipeline_mode = #tpu.pipeline_mode<synchronous>, transform_indices = @transform_2, window_bounds = array<i64: 4, 8, 32>}, {pipeline_mode = #tpu.pipeline_mode<synchronous>, transform_indices = @transform_3, window_bounds = array<i64: 1, 32>}, {transform_indices = @transform_4, window_bounds = array<i64: 8, 32>}]} {
    %c0 = arith.constant 0 : index
    %c0_0 = arith.constant 0 : index
    %0 = vector.load %arg2[%c0, %c0_0] : memref<8x96xbf16, #tpu.memory_space<vmem>>, vector<8x96xbf16>
    %1 = tpu.iota {dimensions = array<i32: 0>} : vector<8x8xi32>
    %2 = tpu.iota {dimensions = array<i32: 1>} : vector<8x8xi32>
    %3 = arith.cmpi sge, %1, %2 : vector<8x8xi32>
    %c0_1 = arith.constant 0 : index
    %c0_2 = arith.constant 0 : index
    %4 = vector.load %arg1[%c0_1, %c0_2] : memref<8x32xf32, #tpu.memory_space<vmem>>, vector<8x32xf32>
    %c0_3 = arith.constant 0 : index
    %c0_4 = arith.constant 0 : index
    %5 = vector.load %arg4[%c0_3, %c0_4] : memref<1x32xf32, #tpu.memory_space<vmem>>, vector<1x32xf32>
    %6 = vector.broadcast %5 : vector<1x32xf32> to vector<8x32xf32>
    %7 = arith.addf %4, %6 : vector<8x32xf32>
    %8 = vector.extract_strided_slice %0 {offsets = [0, 0], sizes = [8, 8], strides = [1, 1]} : vector<8x96xbf16> to vector<8x8xbf16>
    %9 = vector.extract_strided_slice %0 {offsets = [0, 32], sizes = [8, 8], strides = [1, 1]} : vector<8x96xbf16> to vector<8x8xbf16>
    %10 = vector.extract_strided_slice %0 {offsets = [0, 64], sizes = [8, 8], strides = [1, 1]} : vector<8x96xbf16> to vector<8x8xbf16>
    "tpu.trace_start"() <{level = 10 : i32, message = "qd,kd->qk"}> : () -> ()
    %cst = arith.constant dense<0.000000e+00> : vector<8x8xf32>
    %11 = tpu.matmul %8, %9, %cst {dimension_numbers = #tpu.dot_dimension_numbers<[1], [1], [0], [0], [0, 0, 1, 0], [], []>} : vector<8x8xbf16>, vector<8x8xbf16>, vector<8x8xf32> -> vector<8x8xf32>
    %cst_5 = arith.constant -1.000000e+09 : f32
    "tpu.trace_stop"() : () -> ()
    %12 = vector.broadcast %cst_5 : f32 to vector<8x8xf32>
    %13 = arith.select %3, %11, %12 : vector<8x8xi1>, vector<8x8xf32>
    %cst_6 = arith.constant dense<0xFF800000> : vector<8xf32>
    %14 = vector.multi_reduction <maximumf>, %13, %cst_6 [1] : vector<8x8xf32> to vector<8xf32>
    %15 = vector.shape_cast %14 : vector<8xf32> to vector<8x1xf32>
    %16 = vector.broadcast %15 : vector<8x1xf32> to vector<8x8xf32>
    %17 = arith.subf %13, %16 : vector<8x8xf32>
    %18 = math.exp %17 : vector<8x8xf32>
    %cst_7 = arith.constant dense<0.000000e+00> : vector<8xf32>
    %19 = vector.multi_reduction <add>, %18, %cst_7 [1] : vector<8x8xf32> to vector<8xf32>
    %20 = vector.shape_cast %19 : vector<8xf32> to vector<8x1xf32>
    %21 = tpu.reciprocal %20 {approx = true} : vector<8x1xf32> -> vector<8x1xf32>
    %22 = vector.broadcast %21 : vector<8x1xf32> to vector<8x8xf32>
    %23 = arith.mulf %18, %22 : vector<8x8xf32>
    %24 = arith.truncf %23 : vector<8x8xf32> to vector<8x8xbf16>
    %cst_8 = arith.constant dense<0.000000e+00> : vector<8x8xf32>
    %25 = tpu.matmul %24, %10, %cst_8 {dimension_numbers = #tpu.dot_dimension_numbers<[1], [0], [0], [1], [0, 0, 1, 1], [], []>} : vector<8x8xbf16>, vector<8x8xbf16>, vector<8x8xf32> -> vector<8x8xf32>
    %26 = arith.truncf %25 : vector<8x8xf32> to vector<8x8xbf16>
    %c0_9 = arith.constant 0 : index
    %c0_10 = arith.constant 0 : index
    %c0_11 = arith.constant 0 : index
    %27 = vector.load %arg3[%c0_9, %c0_10, %c0_11] : memref<4x8x32xbf16, #tpu.memory_space<vmem>>, vector<1x8x32xbf16>
    %28 = vector.shape_cast %27 : vector<1x8x32xbf16> to vector<8x32xbf16>
    %cst_12 = arith.constant dense<0.000000e+00> : vector<8x32xf32>
    %29 = tpu.matmul %26, %28, %cst_12 {dimension_numbers = #tpu.dot_dimension_numbers<[1], [0], [0], [1], [0, 0, 1, 1], [], []>} : vector<8x8xbf16>, vector<8x32xbf16>, vector<8x32xf32> -> vector<8x32xf32>
    %30 = arith.addf %7, %29 : vector<8x32xf32>
    %31 = vector.extract_strided_slice %0 {offsets = [0, 8], sizes = [8, 8], strides = [1, 1]} : vector<8x96xbf16> to vector<8x8xbf16>
    %32 = vector.extract_strided_slice %0 {offsets = [0, 40], sizes = [8, 8], strides = [1, 1]} : vector<8x96xbf16> to vector<8x8xbf16>
    %33 = vector.extract_strided_slice %0 {offsets = [0, 72], sizes = [8, 8], strides = [1, 1]} : vector<8x96xbf16> to vector<8x8xbf16>
    "tpu.trace_start"() <{level = 10 : i32, message = "qd,kd->qk"}> : () -> ()
    %cst_13 = arith.constant dense<0.000000e+00> : vector<8x8xf32>
    %34 = tpu.matmul %31, %32, %cst_13 {dimension_numbers = #tpu.dot_dimension_numbers<[1], [1], [0], [0], [0, 0, 1, 0], [], []>} : vector<8x8xbf16>, vector<8x8xbf16>, vector<8x8xf32> -> vector<8x8xf32>
    %cst_14 = arith.constant -1.000000e+09 : f32
    "tpu.trace_stop"() : () -> ()
    %35 = vector.broadcast %cst_14 : f32 to vector<8x8xf32>
    %36 = arith.select %3, %34, %35 : vector<8x8xi1>, vector<8x8xf32>
    %cst_15 = arith.constant dense<0xFF800000> : vector<8xf32>
    %37 = vector.multi_reduction <maximumf>, %36, %cst_15 [1] : vector<8x8xf32> to vector<8xf32>
    %38 = vector.shape_cast %37 : vector<8xf32> to vector<8x1xf32>
    %39 = vector.broadcast %38 : vector<8x1xf32> to vector<8x8xf32>
    %40 = arith.subf %36, %39 : vector<8x8xf32>
    %41 = math.exp %40 : vector<8x8xf32>
    %cst_16 = arith.constant dense<0.000000e+00> : vector<8xf32>
    %42 = vector.multi_reduction <add>, %41, %cst_16 [1] : vector<8x8xf32> to vector<8xf32>
    %43 = vector.shape_cast %42 : vector<8xf32> to vector<8x1xf32>
    %44 = tpu.reciprocal %43 {approx = true} : vector<8x1xf32> -> vector<8x1xf32>
    %45 = vector.broadcast %44 : vector<8x1xf32> to vector<8x8xf32>
    %46 = arith.mulf %41, %45 : vector<8x8xf32>
    %47 = arith.truncf %46 : vector<8x8xf32> to vector<8x8xbf16>
    %cst_17 = arith.constant dense<0.000000e+00> : vector<8x8xf32>
    %48 = tpu.matmul %47, %33, %cst_17 {dimension_numbers = #tpu.dot_dimension_numbers<[1], [0], [0], [1], [0, 0, 1, 1], [], []>} : vector<8x8xbf16>, vector<8x8xbf16>, vector<8x8xf32> -> vector<8x8xf32>
    %49 = arith.truncf %48 : vector<8x8xf32> to vector<8x8xbf16>
    %c1 = arith.constant 1 : index
    %c0_18 = arith.constant 0 : index
    %c0_19 = arith.constant 0 : index
    %50 = vector.load %arg3[%c1, %c0_18, %c0_19] : memref<4x8x32xbf16, #tpu.memory_space<vmem>>, vector<1x8x32xbf16>
    %51 = vector.shape_cast %50 : vector<1x8x32xbf16> to vector<8x32xbf16>
    %cst_20 = arith.constant dense<0.000000e+00> : vector<8x32xf32>
    %52 = tpu.matmul %49, %51, %cst_20 {dimension_numbers = #tpu.dot_dimension_numbers<[1], [0], [0], [1], [0, 0, 1, 1], [], []>} : vector<8x8xbf16>, vector<8x32xbf16>, vector<8x32xf32> -> vector<8x32xf32>
    %53 = arith.addf %30, %52 : vector<8x32xf32>
    %54 = vector.extract_strided_slice %0 {offsets = [0, 16], sizes = [8, 8], strides = [1, 1]} : vector<8x96xbf16> to vector<8x8xbf16>
    %55 = vector.extract_strided_slice %0 {offsets = [0, 48], sizes = [8, 8], strides = [1, 1]} : vector<8x96xbf16> to vector<8x8xbf16>
    %56 = vector.extract_strided_slice %0 {offsets = [0, 80], sizes = [8, 8], strides = [1, 1]} : vector<8x96xbf16> to vector<8x8xbf16>
    "tpu.trace_start"() <{level = 10 : i32, message = "qd,kd->qk"}> : () -> ()
    %cst_21 = arith.constant dense<0.000000e+00> : vector<8x8xf32>
    %57 = tpu.matmul %54, %55, %cst_21 {dimension_numbers = #tpu.dot_dimension_numbers<[1], [1], [0], [0], [0, 0, 1, 0], [], []>} : vector<8x8xbf16>, vector<8x8xbf16>, vector<8x8xf32> -> vector<8x8xf32>
    %cst_22 = arith.constant -1.000000e+09 : f32
    "tpu.trace_stop"() : () -> ()
    %58 = vector.broadcast %cst_22 : f32 to vector<8x8xf32>
    %59 = arith.select %3, %57, %58 : vector<8x8xi1>, vector<8x8xf32>
    %cst_23 = arith.constant dense<0xFF800000> : vector<8xf32>
    %60 = vector.multi_reduction <maximumf>, %59, %cst_23 [1] : vector<8x8xf32> to vector<8xf32>
    %61 = vector.shape_cast %60 : vector<8xf32> to vector<8x1xf32>
    %62 = vector.broadcast %61 : vector<8x1xf32> to vector<8x8xf32>
    %63 = arith.subf %59, %62 : vector<8x8xf32>
    %64 = math.exp %63 : vector<8x8xf32>
    %cst_24 = arith.constant dense<0.000000e+00> : vector<8xf32>
    %65 = vector.multi_reduction <add>, %64, %cst_24 [1] : vector<8x8xf32> to vector<8xf32>
    %66 = vector.shape_cast %65 : vector<8xf32> to vector<8x1xf32>
    %67 = tpu.reciprocal %66 {approx = true} : vector<8x1xf32> -> vector<8x1xf32>
    %68 = vector.broadcast %67 : vector<8x1xf32> to vector<8x8xf32>
    %69 = arith.mulf %64, %68 : vector<8x8xf32>
    %70 = arith.truncf %69 : vector<8x8xf32> to vector<8x8xbf16>
    %cst_25 = arith.constant dense<0.000000e+00> : vector<8x8xf32>
    %71 = tpu.matmul %70, %56, %cst_25 {dimension_numbers = #tpu.dot_dimension_numbers<[1], [0], [0], [1], [0, 0, 1, 1], [], []>} : vector<8x8xbf16>, vector<8x8xbf16>, vector<8x8xf32> -> vector<8x8xf32>
    %72 = arith.truncf %71 : vector<8x8xf32> to vector<8x8xbf16>
    %c2 = arith.constant 2 : index
    %c0_26 = arith.constant 0 : index
    %c0_27 = arith.constant 0 : index
    %73 = vector.load %arg3[%c2, %c0_26, %c0_27] : memref<4x8x32xbf16, #tpu.memory_space<vmem>>, vector<1x8x32xbf16>
    %74 = vector.shape_cast %73 : vector<1x8x32xbf16> to vector<8x32xbf16>
    %cst_28 = arith.constant dense<0.000000e+00> : vector<8x32xf32>
    %75 = tpu.matmul %72, %74, %cst_28 {dimension_numbers = #tpu.dot_dimension_numbers<[1], [0], [0], [1], [0, 0, 1, 1], [], []>} : vector<8x8xbf16>, vector<8x32xbf16>, vector<8x32xf32> -> vector<8x32xf32>
    %76 = arith.addf %53, %75 : vector<8x32xf32>
    %77 = vector.extract_strided_slice %0 {offsets = [0, 24], sizes = [8, 8], strides = [1, 1]} : vector<8x96xbf16> to vector<8x8xbf16>
    %78 = vector.extract_strided_slice %0 {offsets = [0, 56], sizes = [8, 8], strides = [1, 1]} : vector<8x96xbf16> to vector<8x8xbf16>
    %79 = vector.extract_strided_slice %0 {offsets = [0, 88], sizes = [8, 8], strides = [1, 1]} : vector<8x96xbf16> to vector<8x8xbf16>
    "tpu.trace_start"() <{level = 10 : i32, message = "qd,kd->qk"}> : () -> ()
    %cst_29 = arith.constant dense<0.000000e+00> : vector<8x8xf32>
    %80 = tpu.matmul %77, %78, %cst_29 {dimension_numbers = #tpu.dot_dimension_numbers<[1], [1], [0], [0], [0, 0, 1, 0], [], []>} : vector<8x8xbf16>, vector<8x8xbf16>, vector<8x8xf32> -> vector<8x8xf32>
    %cst_30 = arith.constant -1.000000e+09 : f32
    "tpu.trace_stop"() : () -> ()
    %81 = vector.broadcast %cst_30 : f32 to vector<8x8xf32>
    %82 = arith.select %3, %80, %81 : vector<8x8xi1>, vector<8x8xf32>
    %cst_31 = arith.constant dense<0xFF800000> : vector<8xf32>
    %83 = vector.multi_reduction <maximumf>, %82, %cst_31 [1] : vector<8x8xf32> to vector<8xf32>
    %84 = vector.shape_cast %83 : vector<8xf32> to vector<8x1xf32>
    %85 = vector.broadcast %84 : vector<8x1xf32> to vector<8x8xf32>
    %86 = arith.subf %82, %85 : vector<8x8xf32>
    %87 = math.exp %86 : vector<8x8xf32>
    %cst_32 = arith.constant dense<0.000000e+00> : vector<8xf32>
    %88 = vector.multi_reduction <add>, %87, %cst_32 [1] : vector<8x8xf32> to vector<8xf32>
    %89 = vector.shape_cast %88 : vector<8xf32> to vector<8x1xf32>
    %90 = tpu.reciprocal %89 {approx = true} : vector<8x1xf32> -> vector<8x1xf32>
    %91 = vector.broadcast %90 : vector<8x1xf32> to vector<8x8xf32>
    %92 = arith.mulf %87, %91 : vector<8x8xf32>
    %93 = arith.truncf %92 : vector<8x8xf32> to vector<8x8xbf16>
    %cst_33 = arith.constant dense<0.000000e+00> : vector<8x8xf32>
    %94 = tpu.matmul %93, %79, %cst_33 {dimension_numbers = #tpu.dot_dimension_numbers<[1], [0], [0], [1], [0, 0, 1, 1], [], []>} : vector<8x8xbf16>, vector<8x8xbf16>, vector<8x8xf32> -> vector<8x8xf32>
    %95 = arith.truncf %94 : vector<8x8xf32> to vector<8x8xbf16>
    %c3 = arith.constant 3 : index
    %c0_34 = arith.constant 0 : index
    %c0_35 = arith.constant 0 : index
    %96 = vector.load %arg3[%c3, %c0_34, %c0_35] : memref<4x8x32xbf16, #tpu.memory_space<vmem>>, vector<1x8x32xbf16>
    %97 = vector.shape_cast %96 : vector<1x8x32xbf16> to vector<8x32xbf16>
    %cst_36 = arith.constant dense<0.000000e+00> : vector<8x32xf32>
    %98 = tpu.matmul %95, %97, %cst_36 {dimension_numbers = #tpu.dot_dimension_numbers<[1], [0], [0], [1], [0, 0, 1, 1], [], []>} : vector<8x8xbf16>, vector<8x32xbf16>, vector<8x32xf32> -> vector<8x32xf32>
    %99 = arith.addf %76, %98 : vector<8x32xf32>
    %c0_37 = arith.constant 0 : index
    %c0_38 = arith.constant 0 : index
    %100 = vector.load %arg5[%c0_37, %c0_38] : memref<8x32xf32, #tpu.memory_space<vmem>>, vector<8x32xf32>
    tpu.vector_store %arg5[%c0_37, %c0_38], %99 {strides = array<i32>} : memref<8x32xf32, #tpu.memory_space<vmem>>, vector<8x32xf32>,
    return
  }
  func.func @transform_0(%arg0: i32) -> (i32, i32) {
    %c0_i32 = arith.constant 0 : i32
    %c0_i32_0 = arith.constant 0 : i32
    return %arg0, %c0_i32 : i32, i32
  }
  func.func @transform_1(%arg0: i32) -> (i32, i32) {
    %c0_i32 = arith.constant 0 : i32
    %c0_i32_0 = arith.constant 0 : i32
    return %arg0, %c0_i32 : i32, i32
  }
  func.func @transform_2(%arg0: i32) -> (i32, i32, i32) {
    %c0_i32 = arith.constant 0 : i32
    %c0_i32_0 = arith.constant 0 : i32
    %c0_i32_1 = arith.constant 0 : i32
    %c0_i32_2 = arith.constant 0 : i32
    return %c0_i32, %c0_i32_0, %c0_i32_1 : i32, i32, i32
  }
  func.func @transform_3(%arg0: i32) -> (i32, i32) {
    %c0_i32 = arith.constant 0 : i32
    %c0_i32_0 = arith.constant 0 : i32
    %c0_i32_1 = arith.constant 0 : i32
    return %c0_i32, %c0_i32_0 : i32, i32
  }
  func.func @transform_4(%arg0: i32) -> (i32, i32) {
    %c0_i32 = arith.constant 0 : i32
    %c0_i32_0 = arith.constant 0 : i32
    return %arg0, %c0_i32 : i32, i32
  }
}

module attributes {stable_mosaic.version = 11 : i64} {
  func.func @ln_ffn_kernel(%arg0: i32, %arg1: memref<8x32xf32, #tpu.memory_space<vmem>>, %arg2: memref<1x32xf32, #tpu.memory_space<vmem>>, %arg3: memref<1x32xf32, #tpu.memory_space<vmem>>, %arg4: memref<32x64xbf16, #tpu.memory_space<vmem>>, %arg5: memref<1x64xf32, #tpu.memory_space<vmem>>, %arg6: memref<64x32xbf16, #tpu.memory_space<vmem>>, %arg7: memref<1x32xf32, #tpu.memory_space<vmem>>, %arg8: memref<8x32xf32, #tpu.memory_space<vmem>>) attributes {dimension_semantics = [#tpu.dimension_semantics<parallel>], iteration_bounds = array<i64: 2>, scalar_prefetch = 0 : i64, scratch_operands = 0 : i64, tpu.core_type = #tpu.core_type<tc>, window_params = [{transform_indices = @transform_0, window_bounds = array<i64: 8, 32>}, {pipeline_mode = #tpu.pipeline_mode<synchronous>, transform_indices = @transform_1, window_bounds = array<i64: 1, 32>}, {pipeline_mode = #tpu.pipeline_mode<synchronous>, transform_indices = @transform_2, window_bounds = array<i64: 1, 32>}, {pipeline_mode = #tpu.pipeline_mode<synchronous>, transform_indices = @transform_3, window_bounds = array<i64: 32, 64>}, {pipeline_mode = #tpu.pipeline_mode<synchronous>, transform_indices = @transform_4, window_bounds = array<i64: 1, 64>}, {pipeline_mode = #tpu.pipeline_mode<synchronous>, transform_indices = @transform_5, window_bounds = array<i64: 64, 32>}, {pipeline_mode = #tpu.pipeline_mode<synchronous>, transform_indices = @transform_6, window_bounds = array<i64: 1, 32>}, {transform_indices = @transform_7, window_bounds = array<i64: 8, 32>}]} {
    %c0 = arith.constant 0 : index
    %c0_0 = arith.constant 0 : index
    %0 = vector.load %arg1[%c0, %c0_0] : memref<8x32xf32, #tpu.memory_space<vmem>>, vector<8x32xf32>
    %c0_1 = arith.constant 0 : index
    %c0_2 = arith.constant 0 : index
    %1 = vector.load %arg2[%c0_1, %c0_2] : memref<1x32xf32, #tpu.memory_space<vmem>>, vector<1x32xf32>
    %c0_3 = arith.constant 0 : index
    %c0_4 = arith.constant 0 : index
    %2 = vector.load %arg3[%c0_3, %c0_4] : memref<1x32xf32, #tpu.memory_space<vmem>>, vector<1x32xf32>
    %cst = arith.constant dense<0.000000e+00> : vector<8xf32>
    %3 = vector.multi_reduction <add>, %0, %cst [1] : vector<8x32xf32> to vector<8xf32>
    %4 = vector.shape_cast %3 : vector<8xf32> to vector<8x1xf32>
    %cst_5 = arith.constant 3.200000e+01 : f32
    %5 = vector.broadcast %cst_5 : f32 to vector<8x1xf32>
    %6 = arith.divf %4, %5 : vector<8x1xf32>
    %7 = vector.broadcast %6 : vector<8x1xf32> to vector<8x32xf32>
    %8 = arith.subf %0, %7 : vector<8x32xf32>
    %9 = arith.mulf %8, %8 : vector<8x32xf32>
    %cst_6 = arith.constant dense<0.000000e+00> : vector<8xf32>
    %10 = vector.multi_reduction <add>, %9, %cst_6 [1] : vector<8x32xf32> to vector<8xf32>
    %11 = vector.shape_cast %10 : vector<8xf32> to vector<8x1xf32>
    %cst_7 = arith.constant 3.200000e+01 : f32
    %12 = vector.broadcast %cst_7 : f32 to vector<8x1xf32>
    %13 = arith.divf %11, %12 : vector<8x1xf32>
    %14 = vector.broadcast %6 : vector<8x1xf32> to vector<8x32xf32>
    %15 = arith.subf %0, %14 : vector<8x32xf32>
    %cst_8 = arith.constant 9.99999974E-6 : f32
    %16 = vector.broadcast %cst_8 : f32 to vector<8x1xf32>
    %17 = arith.addf %13, %16 : vector<8x1xf32>
    %18 = math.rsqrt %17 : vector<8x1xf32>
    %19 = vector.broadcast %18 : vector<8x1xf32> to vector<8x32xf32>
    %20 = arith.mulf %15, %19 : vector<8x32xf32>
    %21 = vector.broadcast %1 : vector<1x32xf32> to vector<8x32xf32>
    %22 = arith.mulf %20, %21 : vector<8x32xf32>
    %23 = vector.broadcast %2 : vector<1x32xf32> to vector<8x32xf32>
    %24 = arith.addf %22, %23 : vector<8x32xf32>
    %25 = arith.truncf %24 : vector<8x32xf32> to vector<8x32xbf16>
    %c0_9 = arith.constant 0 : index
    %c0_10 = arith.constant 0 : index
    %26 = vector.load %arg4[%c0_9, %c0_10] : memref<32x64xbf16, #tpu.memory_space<vmem>>, vector<32x64xbf16>
    %cst_11 = arith.constant dense<0.000000e+00> : vector<8x64xf32>
    %27 = tpu.matmul %25, %26, %cst_11 {dimension_numbers = #tpu.dot_dimension_numbers<[1], [0], [0], [1], [0, 0, 1, 1], [], []>} : vector<8x32xbf16>, vector<32x64xbf16>, vector<8x64xf32> -> vector<8x64xf32>
    %c0_12 = arith.constant 0 : index
    %c0_13 = arith.constant 0 : index
    %28 = vector.load %arg5[%c0_12, %c0_13] : memref<1x64xf32, #tpu.memory_space<vmem>>, vector<1x64xf32>
    %29 = vector.broadcast %28 : vector<1x64xf32> to vector<8x64xf32>
    %30 = arith.addf %27, %29 : vector<8x64xf32>
    %cst_14 = arith.constant 5.000000e-01 : f32
    %31 = vector.broadcast %cst_14 : f32 to vector<8x64xf32>
    %32 = arith.mulf %31, %30 : vector<8x64xf32>
    %cst_15 = arith.constant 4.471500e-02 : f32
    %33 = vector.broadcast %cst_15 : f32 to vector<8x64xf32>
    %34 = arith.mulf %33, %30 : vector<8x64xf32>
    %35 = arith.mulf %34, %30 : vector<8x64xf32>
    %36 = arith.mulf %35, %30 : vector<8x64xf32>
    %37 = arith.addf %30, %36 : vector<8x64xf32>
    %cst_16 = arith.constant 0.797884583 : f32
    %38 = vector.broadcast %cst_16 : f32 to vector<8x64xf32>
    %39 = arith.mulf %38, %37 : vector<8x64xf32>
    %40 = math.tanh %39 : vector<8x64xf32>
    %cst_17 = arith.constant 1.000000e+00 : f32
    %41 = vector.broadcast %cst_17 : f32 to vector<8x64xf32>
    %42 = arith.addf %41, %40 : vector<8x64xf32>
    %43 = arith.mulf %32, %42 : vector<8x64xf32>
    %44 = arith.truncf %43 : vector<8x64xf32> to vector<8x64xbf16>
    %c0_18 = arith.constant 0 : index
    %c0_19 = arith.constant 0 : index
    %45 = vector.load %arg6[%c0_18, %c0_19] : memref<64x32xbf16, #tpu.memory_space<vmem>>, vector<64x32xbf16>
    %cst_20 = arith.constant dense<0.000000e+00> : vector<8x32xf32>
    %46 = tpu.matmul %44, %45, %cst_20 {dimension_numbers = #tpu.dot_dimension_numbers<[1], [0], [0], [1], [0, 0, 1, 1], [], []>} : vector<8x64xbf16>, vector<64x32xbf16>, vector<8x32xf32> -> vector<8x32xf32>
    %c0_21 = arith.constant 0 : index
    %c0_22 = arith.constant 0 : index
    %47 = vector.load %arg7[%c0_21, %c0_22] : memref<1x32xf32, #tpu.memory_space<vmem>>, vector<1x32xf32>
    %48 = vector.broadcast %47 : vector<1x32xf32> to vector<8x32xf32>
    %49 = arith.addf %46, %48 : vector<8x32xf32>
    %50 = arith.addf %0, %49 : vector<8x32xf32>
    %c0_23 = arith.constant 0 : index
    %c0_24 = arith.constant 0 : index
    %51 = vector.load %arg8[%c0_23, %c0_24] : memref<8x32xf32, #tpu.memory_space<vmem>>, vector<8x32xf32>
    tpu.vector_store %arg8[%c0_23, %c0_24], %50 {strides = array<i32>} : memref<8x32xf32, #tpu.memory_space<vmem>>, vector<8x32xf32>,
    return
  }
  func.func @transform_0(%arg0: i32) -> (i32, i32) {
    %c0_i32 = arith.constant 0 : i32
    %c0_i32_0 = arith.constant 0 : i32
    return %arg0, %c0_i32 : i32, i32
  }
  func.func @transform_1(%arg0: i32) -> (i32, i32) {
    %c0_i32 = arith.constant 0 : i32
    %c0_i32_0 = arith.constant 0 : i32
    %c0_i32_1 = arith.constant 0 : i32
    return %c0_i32, %c0_i32_0 : i32, i32
  }
  func.func @transform_2(%arg0: i32) -> (i32, i32) {
    %c0_i32 = arith.constant 0 : i32
    %c0_i32_0 = arith.constant 0 : i32
    %c0_i32_1 = arith.constant 0 : i32
    return %c0_i32, %c0_i32_0 : i32, i32
  }
  func.func @transform_3(%arg0: i32) -> (i32, i32) {
    %c0_i32 = arith.constant 0 : i32
    %c0_i32_0 = arith.constant 0 : i32
    %c0_i32_1 = arith.constant 0 : i32
    return %c0_i32, %c0_i32_0 : i32, i32
  }
  func.func @transform_4(%arg0: i32) -> (i32, i32) {
    %c0_i32 = arith.constant 0 : i32
    %c0_i32_0 = arith.constant 0 : i32
    %c0_i32_1 = arith.constant 0 : i32
    return %c0_i32, %c0_i32_0 : i32, i32
  }
  func.func @transform_5(%arg0: i32) -> (i32, i32) {
    %c0_i32 = arith.constant 0 : i32
    %c0_i32_0 = arith.constant 0 : i32
    %c0_i32_1 = arith.constant 0 : i32
    return %c0_i32, %c0_i32_0 : i32, i32
  }
  func.func @transform_6(%arg0: i32) -> (i32, i32) {
    %c0_i32 = arith.constant 0 : i32
    %c0_i32_0 = arith.constant 0 : i32
    %c0_i32_1 = arith.constant 0 : i32
    return %c0_i32, %c0_i32_0 : i32, i32
  }
  func.func @transform_7(%arg0: i32) -> (i32, i32) {
    %c0_i32 = arith.constant 0 : i32
    %c0_i32_0 = arith.constant 0 : i32
    return %arg0, %c0_i32 : i32, i32
  }
}

module attributes {stable_mosaic.version = 11 : i64} {
  func.func @final_kernel(%arg0: i32, %arg1: i32, %arg2: memref<8x32xf32, #tpu.memory_space<vmem>>, %arg3: memref<1x32xf32, #tpu.memory_space<vmem>>, %arg4: memref<1x32xf32, #tpu.memory_space<vmem>>, %arg5: memref<32x128xbf16, #tpu.memory_space<vmem>>, %arg6: memref<1x128xf32, #tpu.memory_space<vmem>>, %arg7: memref<8x128xf32, #tpu.memory_space<vmem>>, %arg8: memref<8x32xbf16, #tpu.memory_space<vmem>>) attributes {dimension_semantics = [#tpu.dimension_semantics<parallel>, #tpu.dimension_semantics<arbitrary>], iteration_bounds = array<i64: 2, 2>, scalar_prefetch = 0 : i64, scratch_operands = 1 : i64, tpu.core_type = #tpu.core_type<tc>, window_params = [{transform_indices = @transform_0, window_bounds = array<i64: 8, 32>}, {pipeline_mode = #tpu.pipeline_mode<synchronous>, transform_indices = @transform_1, window_bounds = array<i64: 1, 32>}, {pipeline_mode = #tpu.pipeline_mode<synchronous>, transform_indices = @transform_2, window_bounds = array<i64: 1, 32>}, {transform_indices = @transform_3, window_bounds = array<i64: 32, 128>}, {transform_indices = @transform_4, window_bounds = array<i64: 1, 128>}, {transform_indices = @transform_5, window_bounds = array<i64: 8, 128>}]} {
    %c0_i32 = arith.constant 0 : i32
    %0 = arith.cmpi eq, %arg1, %c0_i32 : i32
    %1 = arith.extui %0 : i1 to i32
    %c0_i32_0 = arith.constant 0 : i32
    %2 = arith.cmpi ne, %1, %c0_i32_0 : i32
    scf.if %2 {
      %c0_8 = arith.constant 0 : index
      %c0_9 = arith.constant 0 : index
      %10 = vector.load %arg2[%c0_8, %c0_9] : memref<8x32xf32, #tpu.memory_space<vmem>>, vector<8x32xf32>
      %c0_10 = arith.constant 0 : index
      %c0_11 = arith.constant 0 : index
      %11 = vector.load %arg3[%c0_10, %c0_11] : memref<1x32xf32, #tpu.memory_space<vmem>>, vector<1x32xf32>
      %c0_12 = arith.constant 0 : index
      %c0_13 = arith.constant 0 : index
      %12 = vector.load %arg4[%c0_12, %c0_13] : memref<1x32xf32, #tpu.memory_space<vmem>>, vector<1x32xf32>
      %cst_14 = arith.constant dense<0.000000e+00> : vector<8xf32>
      %13 = vector.multi_reduction <add>, %10, %cst_14 [1] : vector<8x32xf32> to vector<8xf32>
      %14 = vector.shape_cast %13 : vector<8xf32> to vector<8x1xf32>
      %cst_15 = arith.constant 3.200000e+01 : f32
      %15 = vector.broadcast %cst_15 : f32 to vector<8x1xf32>
      %16 = arith.divf %14, %15 : vector<8x1xf32>
      %17 = vector.broadcast %16 : vector<8x1xf32> to vector<8x32xf32>
      %18 = arith.subf %10, %17 : vector<8x32xf32>
      %19 = arith.mulf %18, %18 : vector<8x32xf32>
      %cst_16 = arith.constant dense<0.000000e+00> : vector<8xf32>
      %20 = vector.multi_reduction <add>, %19, %cst_16 [1] : vector<8x32xf32> to vector<8xf32>
      %21 = vector.shape_cast %20 : vector<8xf32> to vector<8x1xf32>
      %cst_17 = arith.constant 3.200000e+01 : f32
      %22 = vector.broadcast %cst_17 : f32 to vector<8x1xf32>
      %23 = arith.divf %21, %22 : vector<8x1xf32>
      %24 = vector.broadcast %16 : vector<8x1xf32> to vector<8x32xf32>
      %25 = arith.subf %10, %24 : vector<8x32xf32>
      %cst_18 = arith.constant 9.99999974E-6 : f32
      %26 = vector.broadcast %cst_18 : f32 to vector<8x1xf32>
      %27 = arith.addf %23, %26 : vector<8x1xf32>
      %28 = math.rsqrt %27 : vector<8x1xf32>
      %29 = vector.broadcast %28 : vector<8x1xf32> to vector<8x32xf32>
      %30 = arith.mulf %25, %29 : vector<8x32xf32>
      %31 = vector.broadcast %11 : vector<1x32xf32> to vector<8x32xf32>
      %32 = arith.mulf %30, %31 : vector<8x32xf32>
      %33 = vector.broadcast %12 : vector<1x32xf32> to vector<8x32xf32>
      %34 = arith.addf %32, %33 : vector<8x32xf32>
      %35 = arith.truncf %34 : vector<8x32xf32> to vector<8x32xbf16>
      %c0_19 = arith.constant 0 : index
      %c0_20 = arith.constant 0 : index
      %36 = vector.load %arg8[%c0_19, %c0_20] : memref<8x32xbf16, #tpu.memory_space<vmem>>, vector<8x32xbf16>
      tpu.vector_store %arg8[%c0_19, %c0_20], %35 {strides = array<i32>} : memref<8x32xbf16, #tpu.memory_space<vmem>>, vector<8x32xbf16>,
    } else {
    }
    %c0 = arith.constant 0 : index
    %c0_1 = arith.constant 0 : index
    %3 = vector.load %arg8[%c0, %c0_1] : memref<8x32xbf16, #tpu.memory_space<vmem>>, vector<8x32xbf16>
    %c0_2 = arith.constant 0 : index
    %c0_3 = arith.constant 0 : index
    %4 = vector.load %arg5[%c0_2, %c0_3] : memref<32x128xbf16, #tpu.memory_space<vmem>>, vector<32x128xbf16>
    %cst = arith.constant dense<0.000000e+00> : vector<8x128xf32>
    %5 = tpu.matmul %3, %4, %cst {dimension_numbers = #tpu.dot_dimension_numbers<[1], [0], [0], [1], [0, 0, 1, 1], [], []>} : vector<8x32xbf16>, vector<32x128xbf16>, vector<8x128xf32> -> vector<8x128xf32>
    %c0_4 = arith.constant 0 : index
    %c0_5 = arith.constant 0 : index
    %6 = vector.load %arg6[%c0_4, %c0_5] : memref<1x128xf32, #tpu.memory_space<vmem>>, vector<1x128xf32>
    %7 = vector.broadcast %6 : vector<1x128xf32> to vector<8x128xf32>
    %8 = arith.addf %5, %7 : vector<8x128xf32>
    %c0_6 = arith.constant 0 : index
    %c0_7 = arith.constant 0 : index
    %9 = vector.load %arg7[%c0_6, %c0_7] : memref<8x128xf32, #tpu.memory_space<vmem>>, vector<8x128xf32>
    tpu.vector_store %arg7[%c0_6, %c0_7], %8 {strides = array<i32>} : memref<8x128xf32, #tpu.memory_space<vmem>>, vector<8x128xf32>,
    return
  }
  func.func @transform_0(%arg0: i32, %arg1: i32) -> (i32, i32) {
    %c0_i32 = arith.constant 0 : i32
    %c0_i32_0 = arith.constant 0 : i32
    return %arg0, %c0_i32 : i32, i32
  }
  func.func @transform_1(%arg0: i32, %arg1: i32) -> (i32, i32) {
    %c0_i32 = arith.constant 0 : i32
    %c0_i32_0 = arith.constant 0 : i32
    %c0_i32_1 = arith.constant 0 : i32
    return %c0_i32, %c0_i32_0 : i32, i32
  }
  func.func @transform_2(%arg0: i32, %arg1: i32) -> (i32, i32) {
    %c0_i32 = arith.constant 0 : i32
    %c0_i32_0 = arith.constant 0 : i32
    %c0_i32_1 = arith.constant 0 : i32
    return %c0_i32, %c0_i32_0 : i32, i32
  }
  func.func @transform_3(%arg0: i32, %arg1: i32) -> (i32, i32) {
    %c0_i32 = arith.constant 0 : i32
    %c0_i32_0 = arith.constant 0 : i32
    return %c0_i32, %arg1 : i32, i32
  }
  func.func @transform_4(%arg0: i32, %arg1: i32) -> (i32, i32) {
    %c0_i32 = arith.constant 0 : i32
    %c0_i32_0 = arith.constant 0 : i32
    return %c0_i32, %arg1 : i32, i32
  }
  func.func @transform_5(%arg0: i32, %arg1: i32) -> (i32, i32) {
    %c0_i32 = arith.constant 0 : i32
    return %arg0, %arg1 : i32, i32
  }
}

</mosaic_0001>

<bundles_post_ra>
// kernel: tpu_custom_call.1
= control target key start
LH: loop header
LB: loop body
LE: loop exit
PB: predicated region body
PF: predicated region fallthrough
CT: control target
= control target key end

     0   :  { %6 = vsyncpa [#allocation3], 0  ;;  %s287_s0 = inlined_call_operand.hbm [shape: f32[8,128], index: 0, kind: input, shape index: {}]   ;;  %s288_s1 = inlined_call_operand.hbm [shape: f32[8,128], index: 1, kind: output, shape index: {}]  }
   0x1   :  { %7 = vsyncpa [#allocation4], 0  ;;  %s270_s6 = smov 0  }
   0x2 LB: > { %s149_s7 = sadd.s32 4294967295, %s256_s6   ;;  %p150_p0 = scmp.ge.s32.totalorder %s256_s6, 1  ;;  %s256_s6 = sphi %s270_s6, %s13_s6  }
   0x3   : > { %p60_p1 = scmp.lt.s32.totalorder %s256_s6, 3  ;;  %s72_s10 = sshll.u32 %s287_s0, 4  ;;  %s73_s10 = int_to_ptr.hbm [resolvable:$true] %s72_s10 }
   0x4   : > { %p170_p3 = scmp.eq.s32.totalorder %s149_s7, 0  ;;  %s258_s11 = smov [#allocation2]  }
   0x5   : > { %p61_p2 = pnand %p150_p0, %p60_p1  ;;  %s74_s12 = sshll.u32 %s258_s11, 4  ;;  %s75_s12 = int_to_ptr.vmem [resolvable:$true] %s74_s12 }
   0x7   : > { %p166_p4 = pneg %p61_p2  ;;  %87 = sbr.rel (%p61_p2) target bundleno = 20 (0x14), region = 24 }
   0x9   : > { %p167_p5 = pnand %p170_p3, %p166_p4 }
   0xb   : > { %169 = dma.hbm_to_vmem [thread:$0]  (!%p167_p5), %s73_s10, 128, %s75_s12, [#allocation3]  }
   0xc   : > { %247 = dma.done.wait (%p170_p3), [#allocation3], 128  }
   0xd   : > { %249 = vsyncadd (%p170_p3), [#allocation3], 4294967168  ;;  %s259_s13 = smov [#allocation5]   ;;  %s109_s17 = sshll.u32 %s288_s1, 4  ;;  %v98_v0 = vld [vmem:[#allocation2] sm:$0xff]  ;;  %s110_s17 = int_to_ptr.hbm [resolvable:$true] %s109_s17 }
   0xe   : > { %s107_s14 = sshll.u32 %s259_s13, 4  ;;  %p172_p6 = scmp.eq.s32.totalorder %s149_s7, 1  ;;  %v99_v1 = vadd.f32 1.0, %v98_v0  ;;  %s108_s14 = int_to_ptr.vmem [resolvable:$true] %s107_s14 }
  0x10   : > { %100 = vst [vmem:[#allocation5] sm:$0xff] %v99_v1 }
  0x11   : > { %163 = dma.vmem_to_hbm [thread:$0]  (%p172_p6), %s108_s14, 128, %s110_s17, [#allocation4]  }
  0x12   : > { %251 = dma.done.wait (%p172_p6), [#allocation4], 128  }
  0x13   : > { %253 = vsyncadd (%p172_p6), [#allocation4], 4294967168 }
  0x14 PF: > { %s13_s6 = sadd.s32 1, %s256_s6  }
  0x15   : > { %p10_p7 = scmp.ge.s32.totalorder %s13_s6, 4  }
  0x17   :  { %12 = sbr.rel (!%p10_p7) target bundleno = 2 (0x2), region = 53 }
  0x1c   :  { %123 = vsyncpa [#allocation3], 1 }
  0x1d   :  { %125 = vsyncpa [#allocation3 + $0x1], 1 }
  0x1e   :  { %126 = vsyncpa [#allocation4], 1 }
  0x1f   :  { %128 = vsyncpa [#allocation4 + $0x1], 1 }

// kernel: _gpt1_forward.7
= control target key start
LH: loop header
LB: loop body
LE: loop exit
PB: predicated region body
PF: predicated region fallthrough
CT: control target
= control target key end

     0   :  { %s393_s15 = smov 0   ;;  %s429_s0 = inlined_call_operand.vmem [shape: f32[16,32], index: 0, kind: input, shape index: {}]   ;;  %s430_s1 = inlined_call_operand.vmem [shape: f32[1,32], index: 1, kind: input, shape index: {}]   ;;  %s431_s2 = inlined_call_operand.vmem [shape: f32[1,32], index: 2, kind: input, shape index: {}]   ;;  %s432_s3 = inlined_call_operand.vmem [shape: bf16[32,96], index: 3, kind: input, shape index: {}]   ;;  %s433_s4 = inlined_call_operand.vmem [shape: bf16[16,96], index: 4, kind: output, shape index: {}]  }
   0x1 LB: > { %s324_s16 = sadd.s32 4294967295, %s365_s15   ;;  %p328_p0 = scmp.ge.s32.totalorder %s365_s15, 1  ;;  %s365_s15 = sphi %s393_s15, %s14_s15  }
   0x2   : > { %p161_p1 = scmp.lt.s32.totalorder %s365_s15, 3 }
   0x4   : > { %p162_p2 = pnand %p328_p0, %p161_p1 }
   0x5   : > { %p185_p3 = scmp.lt.s32.totalorder (!%p162_p2), %s324_s16, 1 }
   0x6   : > { %165 = sbr.rel (%p162_p2) target bundleno = 419 (0x1a3), region = 36 }
   0xb   : > { %s435_s16 = smov (!%p185_p3, %s324_s16), 1  ;;  %vm197_vm0 = vcmask 261120   ;;  %v367_v2 = vmov 32.0   ;;  %v343_v14 = vld [vmem:[%s432_s3 + $0x8] sm:$0xff]  ;;  %v342_v15 = vld [vmem:[%s432_s3] sm:$0xff]  ;;  %vm269_vm5 = vcmask 781312  }
   0xc   : > { %s329_s17 = sshll.u32 %s435_s16, 3  ;;  %355 = vrcp.f32 %v367_v2  ;;  %261 = vmatpush.bf16.msra.mxu0 %v343_v14  ;;  %v353_v25 = vld [vmem:[%s430_s1] ss:$0 sm:$0xff]  ;;  %s330_s29 = sshll.u32 %s435_s16, 2 }
   0xd   : > { %s188_s20 = scalar_lea.vmem %s429_s0, %s329_s17  ;;  %v354_v28 = vld [vmem:[%s431_s2] ss:$0 sm:$0xff]  ;;  %s192_s6 = scalar_lea.vmem %s433_s4, %s330_s29 }
   0xe   : > { %v194_v0 = vld [vmem:[%s188_s20] sm:$0xff] }
   0xf   : > { %v198_v1 = vsel %vm197_vm0, %v194_v0, 0.0 }
  0x10   : > { %199 = vadd.xlane.f32.xlu0 %v198_v1  ;;  %262 = vmatpush.bf16.msra.mxu0 %v342_v15 }
  0x12   : > { %v356_v3 = vpop.eup %355 }
  0x13   : > { %v202_v4 = vmul.f32 32.0, %v356_v3  ;;  %vm206_vm1 = vweird.f32 %v356_v3 }
  0x15   : > { %v203_v5 = vsub.f32 1.0, %v202_v4 }
  0x17   : > { %v204_v6 = vmul.f32 %v356_v3, %v203_v5 }
  0x19   : > { %v205_v7 = vadd.f32 %v356_v3, %v204_v6 }
  0x1b   : > { %v207_v8 = vsel %vm206_vm1, %v356_v3, %v205_v7 }
  0x83   : > { %v200_v9 = vpop.xlane.xlu0 %199 }
  0x84   : > { %v208_v10 = vmul.f32 %v207_v8, %v200_v9 }
  0x86   : > { %v209_v11 = vsub.f32 %v194_v0, %v208_v10 }
  0x88   : > { %v210_v12 = vmul.f32 %v209_v11, %v209_v11 }
  0x8a   : > { %v211_v13 = vsel %vm197_vm0, %v210_v12, 0.0 }
  0x8b   : > { %212 = vadd.xlane.f32.xlu0 %v211_v13 }
  0xfe   : > { %v213_v16 = vpop.xlane.xlu0 %212 }
  0xff   : > { %v214_v17 = vmul.f32 %v213_v16, %v207_v8 }
 0x101   : > { %v215_v18 = vadd.f32 1e-05, %v214_v17 }
 0x103   : > { %357 = vrsqrt.f32 %v215_v18  ;;  %vm222_vm3 = vweird.f32 %v215_v18 }
 0x109   : > { %v358_v19 = vpop.eup %357 }
 0x10a   : > { %v217_v20 = vmul.f32 %v358_v19, %v215_v18  ;;  %vm223_vm2 = vweird.f32 %v358_v19 }
 0x10b   : > { %vm224_vm4 = vmor %vm222_vm3, %vm223_vm2 }
 0x10c   : > { %v218_v21 = vmul.f32 %v358_v19, %v217_v20 }
 0x10e   : > { %v219_v22 = vmul.f32 0.5, %v218_v21 }
 0x110   : > { %v220_v23 = vsub.f32 1.5, %v219_v22 }
 0x112   : > { %v221_v24 = vmul.f32 %v358_v19, %v220_v23 }
 0x114   : > { %v225_v26 = vsel %vm224_vm4, %v358_v19, %v221_v24 }
 0x115   : > { %v226_v27 = vmul.f32 %v225_v26, %v209_v11 }
 0x117   : > { %v230_v29 = vmul.f32 %v353_v25, %v226_v27 }
 0x119   : > { %v234_v30 = vadd.f32 %v354_v28, %v230_v29 }
 0x11b   : > { %v235_v31 = vpack.c.bf16 %v234_v30, %v234_v30 }
 0x11d   : > { %339 = vmatmul.msk.bf16.vlgmr.msra.gmra.mxu0 %vm197_vm0, %v235_v31 }
 0x19a   : > { %v264_v32 = vpop.f32.mrf.mxu0 }
 0x19b   : > { %v268_v33 = vpack.c.bf16 %v264_v32, %v264_v32 }
 0x19d   : > { %270 = vst.msk [vmem:[%s192_s6] sm:$0xf] %vm269_vm5, %v268_v33 }
 0x1a2   : > { %v266_v34 = vpop.f32.mrf.mxu0 }
 0x1a3 PF: > { %s14_s15 = sadd.s32 1, %s365_s15  }
 0x1a4   : > { %p11_p4 = scmp.ge.s32.totalorder %s14_s15, 4  }
 0x1a6   :  { %13 = sbr.rel (!%p11_p4) target bundleno = 1 (0x1), region = 66 }

// kernel: _gpt1_forward.9
= control target key start
LH: loop header
LB: loop body
LE: loop exit
PB: predicated region body
PF: predicated region fallthrough
CT: control target
= control target key end

     0   :  { %s580_s24 = smov 0   ;;  %s643_s0 = inlined_call_operand.vmem [shape: f32[16,32], index: 0, kind: input, shape index: {}, may-alias: {0,7}]   ;;  %s644_s1 = inlined_call_operand.vmem [shape: f32[1,32], index: 1, kind: input, shape index: {}]   ;;  %s645_s2 = inlined_call_operand.vmem [shape: f32[1,32], index: 2, kind: input, shape index: {}]   ;;  %s646_s3 = inlined_call_operand.vmem [shape: bf16[32,64], index: 3, kind: input, shape index: {}]   ;;  %s647_s4 = inlined_call_operand.vmem [shape: f32[1,64], index: 4, kind: input, shape index: {}]   ;;  %s648_s5 = inlined_call_operand.vmem [shape: bf16[64,32], index: 5, kind: input, shape index: {}]   ;;  %s649_s6 = inlined_call_operand.vmem [shape: f32[1,32], index: 6, kind: input, shape index: {}]   ;;  %s650_s7 = inlined_call_operand.vmem [shape: f32[16,32], index: 7, kind: output, shape index: {}, may-alias: {0,7}]  }
   0x1 LB: > { %s471_s25 = sadd.s32 4294967295, %s537_s24   ;;  %p475_p0 = scmp.ge.s32.totalorder %s537_s24, 1  ;;  %s537_s24 = sphi %s580_s24, %s17_s24  }
   0x2   : > { %p236_p1 = scmp.lt.s32.totalorder %s537_s24, 3 }
   0x4   : > { %p237_p2 = pnand %p475_p0, %p236_p1 }
   0x5   : > { %p266_p3 = scmp.lt.s32.totalorder (!%p237_p2), %s471_s25, 1 }
   0x6   : > { %240 = sbr.rel (%p237_p2) target bundleno = 570 (0x23a), region = 48 }
   0xb   : > { %s652_s25 = smov (!%p266_p3, %s471_s25), 1  ;;  %vm278_vm0 = vcmask 261120   ;;  %v539_v2 = vmov 32.0   ;;  %v507_v14 = vld [vmem:[%s646_s3 + $0x8] sm:$0xff]  ;;  %v506_v15 = vld [vmem:[%s646_s3] sm:$0xff]  ;;  %v511_v32 = vld [vmem:[%s648_s5 + $0x18] sm:$0xff] }
   0xc   : > { %s476_s26 = sshll.u32 %s652_s25, 3  ;;  %525 = vrcp.f32 %v539_v2  ;;  %346 = vmatpush.bf16.msra.mxu0 %v507_v14  ;;  %v521_v25 = vld [vmem:[%s644_s1] ss:$0 sm:$0xff]  ;;  %407 = vmatpush.bf16.msra.mxu1 %v511_v32  ;;  %v510_v33 = vld [vmem:[%s648_s5 + $0x10] sm:$0xff]  ;;  %v509_v34 = vld [vmem:[%s648_s5 + $0x8] sm:$0xff]  ;;  %vm399_vm5 = vcmask 523264  }
   0xd   : > { %s269_s29 = scalar_lea.vmem %s643_s0, %s476_s26  ;;  %v522_v28 = vld [vmem:[%s645_s2] ss:$0 sm:$0xff]  ;;  %s273_s9 = scalar_lea.vmem %s650_s7, %s476_s26 }
   0xe   : > { %v596_v0 = vld [vmem:[%s269_s29] sm:$0xff] }
   0xf   : > { %v279_v1 = vsel %vm278_vm0, %v596_v0, 0.0  ;;  %v508_v35 = vld [vmem:[%s648_s5] sm:$0xff] }
  0x10   : > { %280 = vadd.xlane.f32.xlu0 %v279_v1  ;;  %347 = vmatpush.bf16.msra.mxu0 %v506_v15  ;;  %v523_v36 = vld [vmem:[%s647_s4] ss:$0 sm:$0xff] }
  0x11   : > { %408 = vmatpush.bf16.msra.mxu1 %v510_v33  ;;  %v524_v50 = vld [vmem:[%s649_s6] ss:$0 sm:$0xff] }
  0x12   : > { %v526_v3 = vpop.eup %525 }
  0x13   : > { %v283_v4 = vmul.f32 32.0, %v526_v3  ;;  %vm287_vm1 = vweird.f32 %v526_v3 }
  0x15   : > { %v284_v5 = vsub.f32 1.0, %v283_v4  ;;  %409 = vmatpush.bf16.msra.mxu1 %v509_v34 }
  0x17   : > { %v285_v6 = vmul.f32 %v526_v3, %v284_v5 }
  0x19   : > { %v286_v7 = vadd.f32 %v526_v3, %v285_v6  ;;  %410 = vmatpush.bf16.msra.mxu1 %v508_v35 }
  0x1b   : > { %v288_v8 = vsel %vm287_vm1, %v526_v3, %v286_v7 }
  0x83   : > { %v281_v9 = vpop.xlane.xlu0 %280 }
  0x84   : > { %v289_v10 = vmul.f32 %v288_v8, %v281_v9 }
  0x86   : > { %v290_v11 = vsub.f32 %v596_v0, %v289_v10 }
  0x88   : > { %v291_v12 = vmul.f32 %v290_v11, %v290_v11 }
  0x8a   : > { %v292_v13 = vsel %vm278_vm0, %v291_v12, 0.0 }
  0x8b   : > { %293 = vadd.xlane.f32.xlu0 %v292_v13 }
  0xfe   : > { %v294_v16 = vpop.xlane.xlu0 %293 }
  0xff   : > { %v295_v17 = vmul.f32 %v294_v16, %v288_v8 }
 0x101   : > { %v296_v18 = vadd.f32 1e-05, %v295_v17 }
 0x103   : > { %527 = vrsqrt.f32 %v296_v18  ;;  %vm303_vm3 = vweird.f32 %v296_v18 }
 0x109   : > { %v528_v19 = vpop.eup %527 }
 0x10a   : > { %v298_v20 = vmul.f32 %v528_v19, %v296_v18  ;;  %vm304_vm2 = vweird.f32 %v528_v19 }
 0x10b   : > { %vm305_vm4 = vmor %vm303_vm3, %vm304_vm2 }
 0x10c   : > { %v299_v21 = vmul.f32 %v528_v19, %v298_v20 }
 0x10e   : > { %v300_v22 = vmul.f32 0.5, %v299_v21 }
 0x110   : > { %v301_v23 = vsub.f32 1.5, %v300_v22 }
 0x112   : > { %v302_v24 = vmul.f32 %v528_v19, %v301_v23 }
 0x114   : > { %v306_v26 = vsel %vm305_vm4, %v528_v19, %v302_v24 }
 0x115   : > { %v307_v27 = vmul.f32 %v306_v26, %v290_v11 }
 0x117   : > { %v311_v29 = vmul.f32 %v521_v25, %v307_v27 }
 0x119   : > { %v315_v30 = vadd.f32 %v522_v28, %v311_v29 }
 0x11b   : > { %v316_v31 = vpack.c.bf16 %v315_v30, %v315_v30 }
 0x11d   : > { %486 = vmatmul.msk.bf16.vlgmr.msra.gmra.mxu0 %vm278_vm0, %v316_v31 }
 0x19a   : > { %v349_v37 = vpop.f32.mrf.mxu0 }
 0x19b   : > { %v350_v38 = vadd.f32 %v523_v36, %v349_v37 }
 0x19d   : > { %v354_v39 = vmul.f32 0.044715, %v350_v38  ;;  %v353_v46 = vmul.f32 0.5, %v350_v38 }
 0x19f   : > { %v355_v40 = vmul.f32 %v354_v39, %v350_v38 }
 0x1a1   : > { %v356_v41 = vmul.f32 %v355_v40, %v350_v38 }
 0x1a2   : > { %v351_v42 = vpop.f32.mrf.mxu0 }
 0x1a3   : > { %v357_v43 = vadd.f32 %v356_v41, %v350_v38 }
 0x1a5   : > { %v358_v44 = vmul.f32 0.7978846, %v357_v43 }
 0x1a7   : > { %529 = vtanh.f32 %v358_v44 }
 0x1ad   : > { %v530_v45 = vpop.eup %529 }
 0x1ae   : > { %v360_v47 = vadd.f32 1.0, %v530_v45 }
 0x1b0   : > { %v361_v48 = vmul.f32 %v360_v47, %v353_v46 }
 0x1b2   : > { %v362_v49 = vpack.c.bf16 %v361_v48, %v361_v48 }
 0x1b4   : > { %503 = vmatmul.msk.bf16.vlgmr.msra.gmra.mxu1 %vm399_vm5, %v362_v49 }
 0x231   : > { %v412_v51 = vpop.f32.mrf.mxu1 }
 0x232   : > { %v413_v52 = vadd.f32 %v524_v50, %v412_v51 }
 0x234   : > { %v416_v53 = vadd.f32 %v413_v52, %v596_v0 }
 0x236   : > { %417 = vst.msk [vmem:[%s273_s9] sm:$0xff] %vm278_vm0, %v416_v53 }
 0x239   : > { %v414_v54 = vpop.f32.mrf.mxu1 }
 0x23a PF: > { %s17_s24 = sadd.s32 1, %s537_s24  }
 0x23b   : > { %p14_p4 = scmp.ge.s32.totalorder %s17_s24, 4  }
 0x23d   :  { %16 = sbr.rel (!%p14_p4) target bundleno = 1 (0x1), region = 78 }

// kernel: _gpt1_forward.13
= control target key start
LH: loop header
LB: loop body
LE: loop exit
PB: predicated region body
PF: predicated region fallthrough
CT: control target
= control target key end

     0   :  { %s989_s0 = inlined_call_operand.vmem [shape: f32[16,32], index: 0, kind: input, shape index: {}]   ;;  %s990_s1 = inlined_call_operand.vmem [shape: f32[1,32], index: 1, kind: input, shape index: {}]   ;;  %s991_s2 = inlined_call_operand.vmem [shape: f32[1,32], index: 2, kind: input, shape index: {}]   ;;  %s992_s3 = inlined_call_operand.vmem [shape: bf16[32,256], index: 3, kind: input, shape index: {}]   ;;  %s993_s4 = inlined_call_operand.vmem [shape: f32[1,256], index: 4, kind: input, shape index: {}]   ;;  %s994_s5 = inlined_call_operand.hbm [shape: f32[16,256], index: 5, kind: output, shape index: {}]  }
   0x1   :  { %999 = sst [smem:[#allocation10_spill]] %s992_s3 }
   0x2   :  { %10 = vsyncpa [#allocation5], 0 }
   0x3   :  { %12 = vsyncpa [#allocation5 + $0x1], 0  ;;  %s793_s18 = smov 0   ;;  %s795_s19 = smov 0  }
   0x4   :  { %s797_s20 = smov 0   ;;  %s799_s21 = smov 0  }
   0x5   :  { %s801_s22 = smov 0   ;;  %s803_s23 = smov 0  }
   0x6   :  { %s805_s24 = smov 0   ;;  %s807_s25 = smov 0  }
   0x7   :  { %s809_s26 = smov 0   ;;  %s811_s27 = smov 0  }
   0x8 LB: > { %1000 = sst [smem:[#allocation7_spill]] %s756_s26  ;;  %s528_s28 = sadd.s32 4294967295, %s760_s27   ;;  %s760_s27 = sphi %s811_s27, %s18_s27   ;;  %s756_s26 = sphi %s809_s26, %s1010_s26   ;;  %s752_s25 = sphi %s807_s25, %s1017_s25   ;;  %s748_s24 = sphi %s805_s24, %s1008_s24   ;;  %s744_s23 = sphi %s803_s23, %s1016_s23   ;;  %s740_s22 = sphi %s801_s22, %s1015_s22   ;;  %s736_s21 = sphi %s799_s21, %s1014_s21   ;;  %s732_s20 = sphi %s797_s20, %s1013_s20   ;;  %s728_s19 = sphi %s795_s19, %s1012_s19   ;;  %s724_s18 = sphi %s793_s18, %s1011_s18  }
   0x9   : > { %s529_s29 = sadd.s32 4294967294, %s760_s27   ;;  %s27_s30 = sadd.s32 1, %s752_s25 }
   0xa   : > { %s30_s6 = sadd.s32 1, %s756_s26  ;;  %p28_p0 = scmp.ge.s32.totalorder %s27_s30, 2 }
   0xb   : > { %s105_s7 = sadd.s32 1, %s740_s22  ;;  %p112_p1 = scmp.ne.s32.totalorder %s740_s22, %s736_s21 }
   0xc   : > { %p113_p2 = scmp.eq.s32.totalorder %s760_s27, 0  ;;  %s1019_s30 = smov (%p28_p0, %s27_s30), 0 }
   0xd   : > { %1001 = sst [smem:[#allocation8_spill]] %s1019_s30  ;;  %s1021_s6 = smov (!%p28_p0, %s30_s6), %s756_s26 }
   0xe   : > { %s102_s8 = ssub.s32 %s752_s25, %s1019_s30  ;;  %p856_p3 = por %p113_p2, %p112_p1 }
   0xf   : > { %p32_p4 = scmp.ge.s32.totalorder %s1021_s6, 2  ;;  %p103_p5 = scmp.eq.s32.totalorder %s102_s8, 0 }
  0x10   : > { %s159_s10 = sadd.s32 1, %s732_s20  ;;  %p169_p6 = scmp.ne.s32.totalorder %s732_s20, %s728_s19 }
  0x11   : > { %s1023_s6 = smov (%p32_p4, %s1021_s6), 0  ;;  %p170_p7 = scmp.eq.s32.totalorder %s528_s28, 3 }
  0x12   : > { %1003 = sst [smem:[#allocation9_spill]] %s1023_s6  ;;  %s154_s12 = ssub.s32 %s756_s26, %s1023_s6 }
  0x13   : > { %s866_s11 = scalar_select %p103_p5, %s740_s22, %s105_s7  }
  0x14   : > { %s156_s13 = sor.u32 %s154_s12, %s102_s8  ;;  %p175_p8 = scmp.ne.s32.totalorder %s728_s19, %s724_s18 }
  0x15   : > { %p157_p9 = scmp.eq.s32.totalorder %s156_s13, 0  ;;  %p872_p10 = por %p170_p7, %p169_p6 }
  0x16   : > { %p176_p11 = scmp.eq.s32.totalorder %s529_s29, 3  ;;  %p531_p13 = scmp.ge.s32.totalorder %s760_s27, 4 }
  0x17   : > { %s877_s15 = scalar_select %p157_p9, %s732_s20, %s159_s10  }
  0x18   : > { %p879_p12 = por %p176_p11, %p175_p8  ;;  %198 = sbr.rel (%p531_p13) target bundleno = 43 (0x2b), region = 24 }
  0x1d   : > { %208 = sbr.rel (!%p856_p3) target bundleno = 43 (0x2b), region = 32  ;;  %s210_s17 = sand.u32 (%p856_p3), 1, %s740_s22  }
  0x1e   : > { %s533_s28 = sshll.u32 (%p856_p3), %s752_s25, 2  ;;  %s532_s7 = sshll.u32 (%p856_p3), %s210_s17, 4 }
  0x1f   : > { %s1006_s3 = sld [smem:[#allocation10_spill]] (%p856_p3)  ;;  %s212_s10 = scalar_lea.vmem (%p856_p3), [#allocation3], %s532_s7 }
  0x25   : > { %s214_s29 = scalar_lea.vmem %s1006_s3, %s533_s28 }
  0x26   : > { %v231_v0 = vld [vmem:[%s214_s29] sm:$0xf]  ;;  %v233_v1 = vld [vmem:[%s214_s29 + $0x8] sm:$0xf]  ;;  %v235_v2 = vld [vmem:[%s214_s29 + $0x10] sm:$0xf] }
  0x27   : > { %232 = vst [vmem:[%s212_s10] sm:$0xf] %v231_v0  ;;  %v237_v3 = vld [vmem:[%s214_s29 + $0x18] sm:$0xf] }
  0x28   : > { %234 = vst [vmem:[%s212_s10 + $0x4] sm:$0xf] %v233_v1 }
  0x29   : > { %236 = vst [vmem:[%s212_s10 + $0x8] sm:$0xf] %v235_v2 }
  0x2a   : > { %238 = vst [vmem:[%s212_s10 + $0xc] sm:$0xf] %v237_v3 }
  0x2b PF: > { %p534_p0 = scmp.ge.s32.totalorder %s760_s27, 1  ;;  %p275_p1 = scmp.lt.s32.totalorder %s760_s27, 5 }
  0x2d   : > { %p276_p2 = pnand %p534_p0, %p275_p1 }
  0x2e   : > { %s282_s9 = sand.u32 (!%p276_p2), 1, %s736_s21   ;;  %s998_s13 = sand.u32 (!%p276_p2), 1, %s728_s19  }
  0x2f   : > { %279 = sbr.rel (%p276_p2) target bundleno = 473 (0x1d9), region = 77  ;;  %s895_s17 = sshll.u32 (!%p276_p2), %s282_s9, 4 }
  0x30   : > { %s899_s28 = sshll.u32 (!%p276_p2), %s998_s13, 3  ;;  %p316_p3 = scmp.lt.s32.totalorder (!%p276_p2), %s748_s24, 1 }
  0x31   : > { %p320_p4 = scmp.lt.s32.totalorder (!%p276_p2), %s744_s23, 1  ;;  %s284_s30 = scalar_lea.vmem (!%p276_p2), [#allocation3], %s895_s17 }
  0x32   : > { %s315_s26 = scalar_lea.vmem (!%p276_p2), [#allocation4], %s899_s28  ;;  %p538_p5 = scmp.ne.s32.totalorder (!%p276_p2), %s744_s23, 0 }
  0x34   : > { %s317_s7 = scalar_select %p316_p3, %s748_s24, 1 }
  0x35   : > { %s905_s8 = scalar_select %p320_p4, %s744_s23, 1 }
  0x36   : > { %s537_s12 = sshll.u32 %s317_s7, 3  ;;  %327 = sbr.rel (%p538_p5) target bundleno = 331 (0x14b), region = 85 }
  0x37   : > { %s319_s3 = scalar_lea.vmem %s989_s0, %s537_s12  ;;  %s322_s9 = scalar_lea.vmem %s993_s4, %s905_s8 }
  0x3b   : > { %v328_v4 = vld [vmem:[%s319_s3] sm:$0xff]  ;;  %vm331_vm0 = vcmask 261120   ;;  %v762_v6 = vmov 32.0   ;;  %vm370_vm5 = vcmask 257024  }
  0x3c   : > { %v332_v5 = vsel %vm331_vm0, %v328_v4, 0.0  ;;  %645 = vrcp.f32 %v762_v6  ;;  %v643_v27 = vld [vmem:[%s990_s1] ss:$0 sm:$0xff] }
  0x3d   : > { %333 = vadd.xlane.f32.xlu0 %v332_v5  ;;  %v644_v29 = vld [vmem:[%s991_s2] ss:$0 sm:$0xff] }
  0x42   : > { %v646_v7 = vpop.eup %645 }
  0x43   : > { %v336_v8 = vmul.f32 32.0, %v646_v7  ;;  %vm340_vm1 = vweird.f32 %v646_v7 }
  0x45   : > { %v337_v9 = vsub.f32 1.0, %v336_v8 }
  0x47   : > { %v338_v10 = vmul.f32 %v646_v7, %v337_v9 }
  0x49   : > { %v339_v11 = vadd.f32 %v646_v7, %v338_v10 }
  0x4b   : > { %v341_v12 = vsel %vm340_vm1, %v646_v7, %v339_v11 }
  0xb0   : > { %v334_v13 = vpop.xlane.xlu0 %333 }
  0xb1   : > { %v342_v14 = vmul.f32 %v341_v12, %v334_v13 }
  0xb3   : > { %v343_v15 = vsub.f32 %v328_v4, %v342_v14 }
  0xb5   : > { %v344_v16 = vmul.f32 %v343_v15, %v343_v15 }
  0xb7   : > { %v345_v17 = vsel %vm331_vm0, %v344_v16, 0.0 }
  0xb8   : > { %346 = vadd.xlane.f32.xlu0 %v345_v17 }
 0x12b   : > { %v347_v18 = vpop.xlane.xlu0 %346 }
 0x12c   : > { %v348_v19 = vmul.f32 %v347_v18, %v341_v12 }
 0x12e   : > { %v349_v20 = vadd.f32 1e-05, %v348_v19 }
 0x130   : > { %647 = vrsqrt.f32 %v349_v20  ;;  %vm356_vm3 = vweird.f32 %v349_v20 }
 0x136   : > { %v648_v21 = vpop.eup %647 }
 0x137   : > { %v351_v22 = vmul.f32 %v648_v21, %v349_v20  ;;  %vm357_vm2 = vweird.f32 %v648_v21 }
 0x138   : > { %vm358_vm4 = vmor %vm356_vm3, %vm357_vm2 }
 0x139   : > { %v352_v23 = vmul.f32 %v648_v21, %v351_v22 }
 0x13b   : > { %v353_v24 = vmul.f32 0.5, %v352_v23 }
 0x13d   : > { %v354_v25 = vsub.f32 1.5, %v353_v24 }
 0x13f   : > { %v355_v26 = vmul.f32 %v648_v21, %v354_v25 }
 0x141   : > { %v359_v28 = vsel %vm358_vm4, %v648_v21, %v355_v26 }
 0x142   : > { %v360_v30 = vmul.f32 %v359_v28, %v343_v15 }
 0x144   : > { %v364_v31 = vmul.f32 %v643_v27, %v360_v30 }
 0x146   : > { %v368_v32 = vadd.f32 %v644_v29, %v364_v31 }
 0x148   : > { %v369_v33 = vpack.c.bf16 %v368_v32, %v368_v32 }
 0x14a   : > { %371 = vst.msk [vmem:[#allocation2] sm:$0xf] %vm370_vm5, %v369_v33 }
 0x14b PF: > { %v554_v34 = vld [vmem:[%s284_s30 + $0x8] sm:$0xff]  ;;  %v553_v35 = vld [vmem:[%s284_s30] sm:$0xff]  ;;  %vm393_vm6 = vcmask 261120   ;;  %s549_s29 = sshll.u32 %s748_s24, 1  ;;  %s426_s30 = sshll.u32 %s315_s26, 4  ;;  %s427_s30 = int_to_ptr.vmem [resolvable:$true] %s426_s30 }
 0x14c   : > { %403 = vmatpush.bf16.msra.mxu0 %v554_v34  ;;  %s422_s10 = sadd.s32 %s744_s23, %s549_s29  ;;  %v649_v37 = vld [vmem:[%s322_s9] ss:$0 sm:$0xff]  ;;  %s1007_s23 = sand.u32 1, %s728_s19  }
 0x14d   : > { %s550_s21 = sshll.u32 %s422_s10, 3  ;;  %s412_s24 = scalar_lea.sflag [#allocation5], %s1007_s23 }
 0x14e   : > { %s424_s7 = scalar_lea.hbm %s994_s5, %s550_s21  ;;  %s670_s9 = scalar_lea.hbm %s994_s5, 32 }
 0x14f   : > { %s428_s17 = sshll.u32 %s424_s7, 4  ;;  %s429_s17 = int_to_ptr.hbm [resolvable:$true] %s428_s17 }
 0x150   : > { %404 = vmatpush.bf16.msra.mxu0 %v553_v35  ;;  %s664_s29 = sshra.s32 %s429_s17, 4  ;;  %s665_s29 = int_to_ptr.hbm [resolvable:$true] %s664_s29 }
 0x151   : > { %v372_v36 = vld [vmem:[#allocation2] sm:$0xf]  ;;  %s666_s10 = scalar_lea.hbm %s665_s29, 8  ;;  %p671_p9 = scmp.lt.s32.totalorder %s665_s29, %s994_s5 }
 0x152   : > { %p667_p6 = scmp.ne.s32.totalorder %s665_s29, %s666_s10  ;;  %p672_p11 = scmp.lt.s32.totalorder %s670_s9, %s666_s10 }
 0x153   : > { %547 = vmatmul.msk.bf16.vlgmr.msra.gmra.mxu0 %vm393_vm6, %v372_v36 }
 0x154   : > { %p668_p7 = pnand %p667_p6, %p872_p10  ;;  %p673_p13 = por %p672_p11, %p671_p9 }
 0x156   : > { %p669_p8 = pneg %p668_p7 }
 0x158   : > { %p674_p0 = pnand %p673_p13, %p669_p8 }
 0x1d0   : > { %v406_v38 = vpop.f32.mrf.mxu0 }
 0x1d1   : > { %v407_v39 = vadd.f32 %v649_v37, %v406_v38 }
 0x1d3   : > { %410 = vst [vmem:[%s315_s26] sm:$0xff] %v407_v39 }
 0x1d4   : > { %677 = shalt.err (!%p674_p0)
}
 0x1d5   : > { %555 = dma.vmem_to_hbm [thread:$0]  (%p872_p10), %s427_s30, 128, %s429_s17, %s412_s24  }
 0x1d8   : > { %v408_v40 = vpop.f32.mrf.mxu0 }
 0x1d9 PF: > { %p561_p1 = scmp.ge.s32.totalorder %s760_s27, 2  ;;  %s440_s26 = sand.u32 1, %s724_s18  }
 0x1da   : > { %s441_s28 = scalar_lea.sflag [#allocation5], %s440_s26 }
 0x1db   : > { %p558_p2 = pnand %p561_p1, %p879_p12 }
 0x1dd   : > { %p559_p3 = pneg %p558_p2 }
 0x1df   : > { %719 = dma.done.wait (%p559_p3), %s441_s28, 128  }
 0x1e0   : > { %721 = vsyncadd (%p559_p3), %s441_s28, 4294967168  ;;  %s18_s27 = sadd.s32 1, %s760_s27   ;;  %s1008_s24 = sld [smem:[#allocation7_spill]] }
 0x1e1   : > { %p15_p4 = scmp.ge.s32.totalorder %s18_s27, 6   ;;  %s1009_s14 = sld [smem:[#allocation8_spill]] }
 0x1e2   : > { %s1010_s26 = sld [smem:[#allocation9_spill]]  ;;  %s1011_s18 = smov %s728_s19 }
 0x1e3   : > { %s1012_s19 = smov %s732_s20  ;;  %s1013_s20 = smov %s877_s15 }
 0x1e4   : > { %s1014_s21 = smov %s740_s22  ;;  %s1015_s22 = smov %s866_s11 }
 0x1e5   : > { %s1016_s23 = smov %s752_s25  ;;  %17 = sbr.rel (!%p15_p4) target bundleno = 8 (0x8), region = 131 }
 0x1e7   : > { %s1017_s25 = smov %s1009_s14 }
 0x1ea   :  { %447 = vsyncpa [#allocation5], 1 }
 0x1eb   :  { %449 = vsyncpa [#allocation5 + $0x1], 1 }

// kernel: _gpt1_forward.8
= control target key start
LH: loop header
LB: loop body
LE: loop exit
PB: predicated region body
PF: predicated region fallthrough
CT: control target
= control target key end

     0   :  { %s717_s15 = smov 0   ;;  %s823_s0 = inlined_call_operand.vmem [shape: f32[16,32], index: 0, kind: input, shape index: {}, may-alias: {0,4}]   ;;  %s824_s1 = inlined_call_operand.vmem [shape: bf16[16,96], index: 1, kind: input, shape index: {}]   ;;  %s825_s2 = inlined_call_operand.vmem [shape: bf16[4,8,32], index: 2, kind: input, shape index: {}]   ;;  %s826_s3 = inlined_call_operand.vmem [shape: f32[1,32], index: 3, kind: input, shape index: {}]   ;;  %s827_s4 = inlined_call_operand.vmem [shape: f32[16,32], index: 4, kind: output, shape index: {}, may-alias: {0,4}]  }
   0x1 LB: > { %s612_s16 = sadd.s32 4294967295, %s679_s15   ;;  %p616_p0 = scmp.ge.s32.totalorder %s679_s15, 1  ;;  %s679_s15 = sphi %s717_s15, %s14_s15  }
   0x2   : > { %p170_p1 = scmp.lt.s32.totalorder %s679_s15, 3 }
   0x4   : > { %p171_p2 = pnand %p616_p0, %p170_p1 }
   0x5   : > { %p198_p3 = scmp.lt.s32.totalorder (!%p171_p2), %s612_s16, 1  ;;  %s681_s21 = smov (!%p171_p2), 96  }
   0x6   : > { %174 = sbr.rel (%p171_p2) target bundleno = 1359 (0x54f), region = 36  ;;  %s682_s22 = smov (!%p171_p2), 120  }
   0x7   : > { %s683_s23 = smov (!%p171_p2), 88   ;;  %s684_s24 = smov (!%p171_p2), 64  }
   0x8   : > { %s685_s25 = smov (!%p171_p2), 56   ;;  %s686_s26 = smov (!%p171_p2), 80  }
   0x9   : > { %s687_s27 = smov (!%p171_p2), 104   ;;  %s688_s28 = smov (!%p171_p2), 112  }
   0xa   : > { %s689_s29 = smov (!%p171_p2), 72   ;;  %s690_s14 = smov (!%p171_p2), 40  }
   0xb   : > { %s829_s16 = smov (!%p198_p3, %s612_s16), 1  ;;  %vm228_vm0 = vcmask 64512   ;;  %v212_v8 = vlaneseq  ;;  %vm266_vm2 = vcmask 1043456   ;;  %v284_v49 = vld [vmem:[%s825_s2] sm:$0xf]  ;;  %vm545_vm3 = vcmask 261120  }
   0xc   : > { %s618_s17 = sshll.u32 %s829_s16, 2  ;;  %v289_v50 = vsel %vm266_vm2, %v284_v49, 0  ;;  %v625_v51 = vld [vmem:[%s825_s2 + $0x4] sm:$0xf]  ;;  %s617_s8 = sshll.u32 %s829_s16, 3 }
   0xd   : > { %s205_s20 = scalar_lea.vmem %s824_s1, %s618_s17  ;;  %v745_v9 = vshrl.u32 %v212_v8, 7  ;;  %v747_v10 = vand.u32 127, %v212_v8  ;;  %298 = vmatpush.bf16.msra.mxu2 %v289_v50  ;;  %v369_v52 = vsel %vm266_vm2, %v625_v51, 0  ;;  %s201_s11 = scalar_lea.vmem %s823_s0, %s617_s8 }
   0xe   : > { %v211_v0 = vld [vmem:[%s205_s20] sm:$0xf]  ;;  %s691_s17 = smov 48  }
   0xf   : > { %v224_v1 = vunpack.c.l.b16 %v211_v0  ;;  %vm216_vm1 = vcmp.ge.s32.totalorder %v745_v9, %v747_v10 }
  0x11   : > { %v731_v2 = vpack.c.b16 %v224_v1, %v224_v1  ;;  %378 = vmatpush.bf16.msrb.mxu2 %v369_v52 }
  0x13   : > { %226 = vrot.lane.b32.xlu0 %v731_v2, %s681_s21  ;;  %305 = vrot.lane.b32.xlu1 %v731_v2, %s682_s22 }
  0x1b   : > { %307 = vrot.lane.b32.xlu0 %v731_v2, %s683_s23 }
  0x23   : > { %261 = vrot.lane.b32.xlu0 %v731_v2, %s684_s24  ;;  %s209_s24 = scalar_lea.vmem %s827_s4, %s617_s8 }
  0x2b   : > { %341 = vrot.lane.b32.xlu0 %v731_v2, %s685_s25 }
  0x33   : > { %387 = vrot.lane.b32.xlu0 %v731_v2, %s686_s26 }
  0x3b   : > { %465 = vrot.lane.b32.xlu0 %v731_v2, %s687_s27 }
  0x43   : > { %385 = vrot.lane.b32.xlu0 %v731_v2, %s688_s28 }
  0x85   : > { %v227_v3 = vpop.permute.xlu0 %226  ;;  %v306_v7 = vpop.permute.xlu1 %305 }
  0x86   : > { %v233_v4 = vsel %vm228_vm0, %v227_v3, 0 }
  0x87   : > { %242 = vmatpush.bf16.xpose.msra.mxu0 %v233_v4  ;;  %v656_v4 = vld [vmem:[%s826_s3] ss:$0 sm:$0xff] }
  0x8d   : > { %v308_v5 = vpop.permute.xlu0 %307 }
  0x8e   : > { %620 = vmatmul.msk.bf16.vlgmr.msra.gmra.mxu0 %vm228_vm0, %v211_v0  ;;  %v313_v6 = vsel %vm228_vm0, %v308_v5, 0  ;;  %v217_v5 = vld [vmem:[%s201_s11] sm:$0xff] }
  0x8f   : > { %322 = vmatpush.bf16.xpose.msra.mxu3 %v313_v6 }
  0x95   : > { %v262_v19 = vpop.permute.xlu0 %261 }
  0x96   : > { %623 = vmatmul.msk.bf16.vlgmr.msra.gmra.mxu3 %vm228_vm0, %v306_v7  ;;  %v268_v35 = vsel %vm266_vm2, %v262_v19, 0  ;;  %v222_v7 = vadd.f32 %v656_v4, %v217_v5 }
  0x97   : > { %277 = vmatpush.bf16.msra.mxu1 %v268_v35 }
  0x9d   : > { %v342_v23 = vpop.permute.xlu0 %341 }
  0x9e   : > { %v347_v36 = vsel %vm266_vm2, %v342_v23, 0 }
  0x9f   : > { %356 = vmatpush.bf16.msrb.mxu1 %v347_v36 }
  0xa5   : > { %v388_v25 = vpop.permute.xlu0 %387 }
  0xa6   : > { %v393_v27 = vsel %vm228_vm0, %v388_v25, 0 }
  0xa7   : > { %402 = vmatpush.bf16.xpose.msrb.mxu0 %v393_v27 }
  0xad   : > { %v466_v31 = vpop.permute.xlu0 %465 }
  0xb5   : > { %v386_v34 = vpop.permute.xlu0 %385 }
  0xb6   : > { %627 = vmatmul.msk.bf16.vlgmr.msrb.gmra.mxu0 %vm228_vm0, %v386_v34  ;;  %v629_v34 = vld [vmem:[%s825_s2 + $0x8] sm:$0xf] }
  0xb7   : > { %v449_v35 = vsel %vm266_vm2, %v629_v34, 0 }
 0x10b   : > { %v244_v11 = vpop.f32.mrf.mxu0 }
 0x10c   : > { %v248_v12 = vsel %vm216_vm1, %v244_v11, -1e+09 }
 0x10d   : > { %v249_v13 = vsel %vm228_vm0, %v248_v12, -inf }
 0x10e   : > { %250 = vmax.xlane.f32.xlu1 %v249_v13 }
 0x113   : > { %v246_v14 = vpop.f32.mrf.mxu0 }
 0x119   : > { %v324_v15 = vpop.f32.mrf.mxu3 }
 0x11a   : > { %v328_v16 = vsel %vm216_vm1, %v324_v15, -1e+09 }
 0x11b   : > { %v329_v17 = vsel %vm228_vm0, %v328_v16, -inf }
 0x11c   : > { %330 = vmax.xlane.f32.xlu2 %v329_v17 }
 0x121   : > { %v326_v18 = vpop.f32.mrf.mxu3 }
 0x133   : > { %v404_v44 = vpop.f32.mrf.mxu0 }
 0x134   : > { %v408_v46 = vsel %vm216_vm1, %v404_v44, -1e+09 }
 0x135   : > { %v409_v47 = vsel %vm228_vm0, %v408_v46, -inf }
 0x13b   : > { %v406_v48 = vpop.f32.mrf.mxu0 }
 0x181   : > { %v251_v20 = vpop.xlane.xlu1 %250 }
 0x182   : > { %v252_v21 = vsub.f32 %v248_v12, %v251_v20 }
 0x184   : > { %v253_v22 = vmul.f32 1.442695, %v252_v21 }
 0x186   : > { %657 = vpow2.f32 %v253_v22 }
 0x18c   : > { %v658_v24 = vpop.eup %657 }
 0x18d   : > { %v255_v26 = vsel %vm228_vm0, %v658_v24, 0.0 }
 0x18e   : > { %256 = vadd.xlane.f32.xlu2 %v255_v26 }
 0x18f   : > { %v331_v28 = vpop.xlane.xlu2 %330 }
 0x190   : > { %v332_v29 = vsub.f32 %v328_v16, %v331_v28 }
 0x192   : > { %v333_v30 = vmul.f32 1.442695, %v332_v29 }
 0x194   : > { %659 = vpow2.f32 %v333_v30 }
 0x19a   : > { %v660_v32 = vpop.eup %659 }
 0x19b   : > { %v335_v33 = vsel %vm228_vm0, %v660_v32, 0.0 }
 0x19c   : > { %336 = vadd.xlane.f32.xlu2 %v335_v33 }
 0x1b4   : > { %467 = vrot.lane.b32.xlu2 %v731_v2, %s689_s29 }
 0x1dd   : > { %410 = vmax.xlane.f32.xlu2 %v409_v47 }
 0x1f5   : > { %501 = vrot.lane.b32.xlu2 %v731_v2, %s690_s14 }
 0x201   : > { %v257_v37 = vpop.xlane.xlu2 %256 }
 0x202   : > { %661 = vrcp.f32 %v257_v37 }
 0x208   : > { %v662_v38 = vpop.eup %661 }
 0x209   : > { %v259_v39 = vmul.f32 %v662_v38, %v658_v24 }
 0x20b   : > { %v260_v40 = vpack.c.bf16 %v259_v39, %v259_v39 }
 0x20d   : > { %621 = vmatmul.msk.bf16.vlgmr.msra.gmra.mxu1 %vm228_vm0, %v260_v40 }
 0x20e   : > { %458 = vmatpush.bf16.msra.mxu1 %v449_v35 }
 0x20f   : > { %v337_v41 = vpop.xlane.xlu2 %336 }
 0x210   : > { %663 = vrcp.f32 %v337_v41 }
 0x216   : > { %v664_v42 = vpop.eup %663 }
 0x217   : > { %v339_v43 = vmul.f32 %v664_v42, %v660_v32  ;;  %v468_v53 = vpop.permute.xlu2 %467  ;;  %v633_v32 = vld [vmem:[%s825_s2 + $0xc] sm:$0xf] }
 0x218   : > { %v473_v56 = vsel %vm228_vm0, %v468_v53, 0  ;;  %v529_v33 = vsel %vm266_vm2, %v633_v32, 0 }
 0x219   : > { %v340_v45 = vpack.c.bf16 %v339_v43, %v339_v43 }
 0x21d   : > { %624 = vmatmul.msk.bf16.vlgmr.msrb.gmra.mxu1 %vm228_vm0, %v340_v45 }
 0x250   : > { %v411_v57 = vpop.xlane.xlu2 %410 }
 0x251   : > { %v412_v58 = vsub.f32 %v408_v46, %v411_v57 }
 0x253   : > { %v413_v60 = vmul.f32 1.442695, %v412_v58 }
 0x255   : > { %665 = vpow2.f32 %v413_v60 }
 0x258   : > { %v502_v9 = vpop.permute.xlu2 %501 }
 0x259   : > { %v507_v10 = vsel %vm266_vm2, %v502_v9, 0 }
 0x25a   : > { %516 = vmatpush.bf16.msra.mxu0 %v507_v10 }
 0x25b   : > { %v666_v62 = vpop.eup %665 }
 0x25c   : > { %v415_v0 = vsel %vm228_vm0, %v666_v62, 0.0 }
 0x25d   : > { %416 = vadd.xlane.f32.xlu0 %v415_v0 }
 0x28a   : > { %v279_v54 = vpop.f32.mrf.mxu1 }
 0x28b   : > { %v283_v55 = vpack.c.bf16 %v279_v54, %v279_v54 }
 0x28d   : > { %622 = vmatmul.msk.bf16.vlgmr.msra.gmra.mxu2 %vm228_vm0, %v283_v55 }
 0x28e   : > { %482 = vmatpush.bf16.xpose.msra.mxu2 %v473_v56 }
 0x292   : > { %v281_v59 = vpop.f32.mrf.mxu1 }
 0x29a   : > { %v358_v61 = vpop.f32.mrf.mxu1 }
 0x29b   : > { %v362_v63 = vpack.c.bf16 %v358_v61, %v358_v61 }
 0x29d   : > { %626 = vmatmul.msk.bf16.vlgmr.msrb.gmra.mxu2 %vm228_vm0, %v362_v63 }
 0x2a2   : > { %v360_v1 = vpop.f32.mrf.mxu1 }
 0x2ad   : > { %631 = vmatmul.msk.bf16.vlgmr.msra.gmra.mxu2 %vm228_vm0, %v466_v31 }
 0x2d0   : > { %v417_v27 = vpop.xlane.xlu0 %416 }
 0x310   : > { %v300_v3 = vpop.f32.mrf.mxu2 }
 0x311   : > { %v304_v8 = vadd.f32 %v300_v3, %v222_v7 }
 0x318   : > { %v302_v6 = vpop.f32.mrf.mxu2 }
 0x320   : > { %v380_v11 = vpop.f32.mrf.mxu2 }
 0x321   : > { %v384_v12 = vadd.f32 %v380_v11, %v304_v8 }
 0x328   : > { %v382_v13 = vpop.f32.mrf.mxu2 }
 0x330   : > { %v484_v14 = vpop.f32.mrf.mxu2 }
 0x331   : > { %v488_v15 = vsel %vm216_vm1, %v484_v14, -1e+09 }
 0x332   : > { %v489_v16 = vsel %vm228_vm0, %v488_v15, -inf }
 0x333   : > { %490 = vmax.xlane.f32.xlu1 %v489_v16 }
 0x338   : > { %v486_v17 = vpop.f32.mrf.mxu2 }
 0x3a6   : > { %v491_v18 = vpop.xlane.xlu1 %490 }
 0x3a7   : > { %v492_v19 = vsub.f32 %v488_v15, %v491_v18 }
 0x3a9   : > { %v493_v20 = vmul.f32 1.442695, %v492_v19 }
 0x3ab   : > { %667 = vpow2.f32 %v493_v20 }
 0x3b1   : > { %v668_v21 = vpop.eup %667 }
 0x3b2   : > { %v495_v22 = vsel %vm228_vm0, %v668_v21, 0.0 }
 0x3b3   : > { %496 = vadd.xlane.f32.xlu1 %v495_v22 }
 0x3cc   : > { %421 = vrot.lane.b32.xlu1 %v731_v2, %s691_s17 }
 0x426   : > { %v497_v23 = vpop.xlane.xlu1 %496 }
 0x427   : > { %669 = vrcp.f32 %v497_v23 }
 0x428   : > { %671 = vrcp.f32 %v417_v27 }
 0x42d   : > { %v670_v24 = vpop.eup %669 }
 0x42e   : > { %v499_v25 = vmul.f32 %v670_v24, %v668_v21  ;;  %v672_v28 = vpop.eup %671 }
 0x42f   : > { %v419_v29 = vmul.f32 %v672_v28, %v666_v62 }
 0x430   : > { %v500_v26 = vpack.c.bf16 %v499_v25, %v499_v25 }
 0x431   : > { %v420_v2 = vpack.c.bf16 %v419_v29, %v419_v29 }
 0x432   : > { %632 = vmatmul.msk.bf16.vlgmr.msra.gmra.mxu0 %vm228_vm0, %v500_v26 }
 0x43e   : > { %v422_v30 = vpop.permute.xlu1 %421 }
 0x43f   : > { %v427_v31 = vsel %vm266_vm2, %v422_v30, 0 }
 0x440   : > { %436 = vmatpush.bf16.msrb.mxu3 %v427_v31 }
 0x443   : > { %628 = vmatmul.msk.bf16.vlgmr.msrb.gmra.mxu3 %vm228_vm0, %v420_v2 }
 0x444   : > { %538 = vmatpush.bf16.msra.mxu3 %v529_v33 }
 0x4af   : > { %v518_v36 = vpop.f32.mrf.mxu0 }
 0x4b0   : > { %v522_v37 = vpack.c.bf16 %v518_v36, %v518_v36 }
 0x4b2   : > { %634 = vmatmul.msk.bf16.vlgmr.msra.gmra.mxu3 %vm228_vm0, %v522_v37 }
 0x4b7   : > { %v520_v38 = vpop.f32.mrf.mxu0 }
 0x4c6   : > { %v438_v39 = vpop.f32.mrf.mxu3 }
 0x4c7   : > { %v442_v40 = vpack.c.bf16 %v438_v39, %v438_v39 }
 0x4c9   : > { %630 = vmatmul.msk.bf16.vlgmr.msra.gmra.mxu1 %vm228_vm0, %v442_v40 }
 0x4ce   : > { %v440_v41 = vpop.f32.mrf.mxu3 }
 0x535   : > { %v540_v42 = vpop.f32.mrf.mxu3 }
 0x53d   : > { %v542_v43 = vpop.f32.mrf.mxu3 }
 0x546   : > { %v460_v44 = vpop.f32.mrf.mxu1 }
 0x547   : > { %v464_v45 = vadd.f32 %v460_v44, %v384_v12 }
 0x549   : > { %v544_v46 = vadd.f32 %v540_v42, %v464_v45 }
 0x54b   : > { %546 = vst.msk [vmem:[%s209_s24] sm:$0xff] %vm545_vm3, %v544_v46 }
 0x54e   : > { %v462_v47 = vpop.f32.mrf.mxu1 }
 0x54f PF: > { %s14_s15 = sadd.s32 1, %s679_s15  }
 0x550   : > { %p11_p4 = scmp.ge.s32.totalorder %s14_s15, 4  }
 0x552   :  { %13 = sbr.rel (!%p11_p4) target bundleno = 1 (0x1), region = 72 }

</bundles_post_ra>
